<compile_context>
chip_gen: v5e
topology: v5e:2x2
jax: 0.10.0
libtpu: 0.0.40
codegen_flags: <defaults>
</compile_context>

<pallas_src>
import math

import numpy as np
import jax
import jax.numpy as jnp
from jax.experimental import pallas as pl
from jax.experimental.pallas import tpu as pltpu

HIGH = jax.lax.Precision.HIGHEST  # reference path only


def _round_up(v, m):
    return ((v + m - 1) // m) * m


# ----------------------------------------------------------------------------
# Skeleton topology helpers (faithful python ports of models/skeleton.py logic)
# ----------------------------------------------------------------------------
def calc_edge_mat(edges):
    edge_num = len(edges)
    edge_mat = [[100000] * edge_num for _ in range(edge_num)]
    for i in range(edge_num):
        edge_mat[i][i] = 0
    for i, a in enumerate(edges):
        for j, b in enumerate(edges):
            link = 0
            for x in range(2):
                for y in range(2):
                    if a[x] == b[y]:
                        link = 1
            if link:
                edge_mat[i][j] = 1
    for k in range(edge_num):
        for i in range(edge_num):
            for j in range(edge_num):
                edge_mat[i][j] = min(edge_mat[i][j], edge_mat[i][k] + edge_mat[k][j])
    return edge_mat


def find_neighbor(edges, d):
    edge_mat = calc_edge_mat(edges)
    edge_num = len(edge_mat)
    neighbor_list = []
    for i in range(edge_num):
        neighbor_list.append([j for j in range(edge_num) if edge_mat[i][j] <= d])
    global_part_neighbor = neighbor_list[0].copy()
    for i in global_part_neighbor:
        neighbor_list[i].append(edge_num)
    global_part_neighbor.append(edge_num)
    neighbor_list.append(global_part_neighbor)
    return neighbor_list


def build_skeleton_pool(edges, channels_per_edge, last_pool):
    edge_num = len(edges) + 1
    seq_list, pooling_list, new_edges = [], [], []
    degree = [0] * 100
    for e in edges:
        degree[e[0]] += 1
        degree[e[1]] += 1

    def find_seq(j, seq):
        if degree[j] > 2 and j != 0:
            seq_list.append(seq)
            seq = []
        if degree[j] == 1:
            seq_list.append(seq)
            return
        for idx, edge in enumerate(edges):
            if edge[0] == j:
                find_seq(edge[1], seq + [idx])

    find_seq(0, [])
    for seq in seq_list:
        if last_pool:
            pooling_list.append(seq)
            continue
        if len(seq) % 2 == 1:
            pooling_list.append([seq[0]])
            new_edges.append(edges[seq[0]])
            seq = seq[1:]
        for i in range(0, len(seq), 2):
            pooling_list.append([seq[i], seq[i + 1]])
            new_edges.append([edges[seq[i]][0], edges[seq[i + 1]][1]])
    pooling_list.append([edge_num - 1])

    weight = np.zeros((len(pooling_list) * channels_per_edge,
                       edge_num * channels_per_edge), np.float32)
    for i, pair in enumerate(pooling_list):
        for j in pair:
            for c in range(channels_per_edge):
                weight[i * channels_per_edge + c, j * channels_per_edge + c] = 1.0 / len(pair)
    return weight, pooling_list, new_edges


def build_skeleton_unpool(pooling_list, channels_per_edge):
    input_edge_num = len(pooling_list)
    output_edge_num = sum(len(t) for t in pooling_list)
    weight = np.zeros((output_edge_num * channels_per_edge,
                       input_edge_num * channels_per_edge), np.float32)
    for i, pair in enumerate(pooling_list):
        for j in pair:
            for c in range(channels_per_edge):
                weight[j * channels_per_edge + c, i * channels_per_edge + c] = 1.0
    return weight


def build_upsample_matrix(t_in, scale=2):
    # nn.Upsample(scale_factor=2, mode='linear', align_corners=False) as a (Tin, Tout) matrix
    t_out = t_in * scale
    U = np.zeros((t_in, t_out), np.float32)
    for i in range(t_out):
        src = (i + 0.5) / scale - 0.5
        if src < 0.0:
            src = 0.0
        left = min(int(math.floor(src)), t_in - 1)
        frac = src - left
        right = min(left + 1, t_in - 1)
        U[left, i] += (1.0 - frac)
        U[right, i] += frac
    return U


def init_conv_params(key, neighbor_list, in_channels, out_channels, joint_num, K):
    # SkeletonConv: dense Conv1d weight multiplied by a skeleton-neighborhood mask.
    in_per = in_channels // joint_num
    out_per = out_channels // joint_num
    mask = np.zeros((out_channels, in_channels, K), np.float32)
    for i, neigh in enumerate(neighbor_list):
        expanded = [k * in_per + c for k in neigh for c in range(in_per)]
        mask[out_per * i: out_per * (i + 1), expanded, :] = 1.0
    kw, kb = jax.random.split(key)
    w = jax.random.normal(kw, (out_channels, in_channels, K), jnp.float32) * 0.1
    b = jax.random.normal(kb, (out_channels,), jnp.float32) * 0.1
    w = w * jnp.asarray(mask)
    return w, b


# ----------------------------------------------------------------------------
# Folded-path kernel: whole AE in one pallas_call, one lane-dense matmul per layer.
#   x: (rows, P0) with rows = sublane-padded batch slice, P0 = 128-padded Cin*Tin
#   per layer: y = x @ M_l + b_l  (+ LeakyReLU); padding columns stay exactly zero.
# ----------------------------------------------------------------------------
def _make_folded_kernel(relu_flags, num_enc):
    n_layers = len(relu_flags)

    def kernel(*refs):
        x_ref = refs[0]
        latent_ref = refs[1 + 2 * n_layers]
        out_ref = refs[2 + 2 * n_layers]

        x = x_ref[0]                                    # (rows, P0)
        for li in range(n_layers):
            m = refs[1 + 2 * li][...]                   # (P_in, P_out), (8,128)-aligned
            bias = refs[2 + 2 * li][...]                # (1, P_out)
            y = jnp.dot(x, m, preferred_element_type=jnp.float32) + bias
            if relu_flags[li]:
                y = jnp.where(y >= 0, y, 0.2 * y)       # LeakyReLU(0.2)
            x = y
            if li == num_enc - 1:
                latent_ref[0] = x                       # encoder output (lane-dense)
        out_ref[0] = x                                  # decoder output (lane-dense)

    return kernel


def _ae_forward_folded(fused, x):
    layers = fused['layers']
    num_enc = fused['num_enc']
    B, cin, T = x.shape
    d0 = cin * T
    P0 = layers[0]['m'].shape[0]
    P_lat = layers[num_enc - 1]['m'].shape[1]
    P_out = layers[-1]['m'].shape[1]
    lat_c, lat_t = fused['lat_shape']
    out_c, out_t = fused['out_shape']

    # Collapse the batch; keep a 2-way "parallel" split so both v7x TensorCores stay busy.
    gb = 2 if (B % 2 == 0 and B >= 2) else 1
    bpg = B // gb
    rows = _round_up(bpg, 8)                 # sublane-aligned rows per block

    x3 = x.reshape(gb, bpg, d0)
    x3 = jnp.pad(x3, ((0, 0), (0, rows - bpg), (0, P0 - d0)))

    in_specs = [pl.BlockSpec((1, rows, P0), lambda g: (g, 0, 0))]
    operands = [x3]
    for lyr in layers:
        in_specs.append(pl.BlockSpec(lyr['m'].shape, lambda g: (0, 0)))
        in_specs.append(pl.BlockSpec(lyr['bflat'].shape, lambda g: (0, 0)))
        operands += [lyr['m'], lyr['bflat']]

    lat3, out3 = pl.pallas_call(
        _make_folded_kernel(tuple(l['relu'] for l in layers), num_enc),
        out_shape=(jax.ShapeDtypeStruct((gb, rows, P_lat), jnp.float32),
                   jax.ShapeDtypeStruct((gb, rows, P_out), jnp.float32)),
        grid=(gb,),
        in_specs=in_specs,
        out_specs=(pl.BlockSpec((1, rows, P_lat), lambda g: (g, 0, 0)),
                   pl.BlockSpec((1, rows, P_out), lambda g: (g, 0, 0))),
        compiler_params=pltpu.CompilerParams(dimension_semantics=("parallel",)),
    )(*operands)

    latent = lat3[:, :bpg, :lat_c * lat_t].reshape(B, lat_c, lat_t)
    result = out3[:, :bpg, :out_c * out_t].reshape(B, out_c, out_t)
    return latent, result


# ----------------------------------------------------------------------------
# Factored fallback kernel (for long sequences, where the folded M ~ T^2 would blow VMEM):
# per layer  y = bias + sum_k W_k @ (x @ T_k), whole AE fused, grid over batch.
# ----------------------------------------------------------------------------
def _make_factored_kernel(relu_flags, K, num_enc):
    n_layers = len(relu_flags)

    def kernel(*refs):
        x_ref = refs[0]
        latent_ref = refs[1 + 3 * n_layers]
        out_ref = refs[2 + 3 * n_layers]

        x = x_ref[0]                                   # (Cin, Tin) of current layer
        for li in range(n_layers):
            w_ref = refs[1 + 3 * li]                   # (K, Cout, Cin)
            t_ref = refs[2 + 3 * li]                   # (K, Tin, Tout)
            b_ref = refs[3 + 3 * li]                   # (Cout, 1)
            cout = w_ref.shape[1]
            tout = t_ref.shape[2]
            # Single accumulator seeded with the bias (in-place MRB accumulation on v7x).
            y = jnp.zeros((cout, tout), jnp.float32) + b_ref[...]
            for k in range(K):
                xk = jnp.dot(x, t_ref[k], preferred_element_type=jnp.float32)
                y = y + jnp.dot(w_ref[k], xk, preferred_element_type=jnp.float32)
            if relu_flags[li]:
                y = jnp.where(y >= 0, y, 0.2 * y)      # LeakyReLU(0.2)
            x = y
            if li == num_enc - 1:
                latent_ref[0] = x
        out_ref[0] = x

    return kernel


def _ae_forward_factored(fused, x):
    layers = fused['layers']
    num_enc = fused['num_enc']
    B, cin, T = x.shape
    K = layers[0]['w'].shape[0]
    lat_c, lat_t = fused['lat_shape']
    out_c, out_t = fused['out_shape']

    in_specs = [pl.BlockSpec((1, cin, T), lambda b: (b, 0, 0))]
    operands = [x]
    for lyr in layers:
        in_specs.append(pl.BlockSpec(lyr['w'].shape, lambda b: (0, 0, 0)))
        in_specs.append(pl.BlockSpec(lyr['t'].shape, lambda b: (0, 0, 0)))
        in_specs.append(pl.BlockSpec(lyr['b'].shape, lambda b: (0, 0)))
        operands += [lyr['w'], lyr['t'], lyr['b']]

    latent, result = pl.pallas_call(
        _make_factored_kernel(tuple(l['relu'] for l in layers), K, num_enc),
        out_shape=(jax.ShapeDtypeStruct((B, lat_c, lat_t), jnp.float32),
                   jax.ShapeDtypeStruct((B, out_c, out_t), jnp.float32)),
        grid=(B,),
        in_specs=in_specs,
        out_specs=(pl.BlockSpec((1, lat_c, lat_t), lambda b: (b, 0, 0)),
                   pl.BlockSpec((1, out_c, out_t), lambda b: (b, 0, 0))),
        compiler_params=pltpu.CompilerParams(dimension_semantics=("parallel",)),
    )(*operands)
    return latent, result


def ae_forward(fused, x, force_factored=False):
    if fused['folded'] and not force_factored:
        return _ae_forward_folded(fused, x)
    return _ae_forward_factored(fused, x)


# ----------------------------------------------------------------------------
# AE construction (mirrors Encoder.__init__ / Decoder.__init__) + build-time folding.
# All padding / stride / upsample / pool / unpool / channel-drop algebra is folded into
# per-layer constants (numpy f32, once, at build time).
# ----------------------------------------------------------------------------
def build_ae(key, topology, seq_len, num_layers=2, kernel_size=3, skeleton_dist=1,
             fold_vmem_budget_bytes=12 * 1024 * 1024):
    K = kernel_size
    pad = (K - 1) // 2
    channel_base = [4]                      # args.rotation == 'quaternion'
    for _ in range(num_layers):
        channel_base.append(channel_base[-1] * 2)

    topologies = [topology]
    edge_num = [len(topology) + 1]
    channel_list = []
    pooling_lists = []
    enc_ref, dec_ref, layers = [], [], []
    keys = jax.random.split(key, 2 * num_layers)

    t_cur = seq_len
    # ---------------- Encoder layers ----------------
    for i in range(num_layers):
        neighbor_list = find_neighbor(topologies[i], skeleton_dist)
        in_ch = channel_base[i] * edge_num[i]
        out_ch = channel_base[i + 1] * edge_num[i]
        if i == 0:
            channel_list.append(in_ch)
        channel_list.append(out_ch)
        w3d, b = init_conv_params(keys[i], neighbor_list, in_ch, out_ch, edge_num[i], K)
        last_pool = (i == num_layers - 1)
        pool_w, pooling_list, new_edges = build_skeleton_pool(
            topologies[i], out_ch // len(neighbor_list), last_pool)

        # Fold pool into conv weights / bias (exact, f32).
        w_np, b_np = np.asarray(w3d), np.asarray(b)
        wf = np.einsum('pc,cik->kpi', pool_w, w_np).astype(np.float32)   # (K, Cpool, Cin)
        bf = (pool_w @ b_np).astype(np.float32)
        if i == 0:
            wf = wf[:, :, :in_ch - 1]   # fold away the appended all-zero quaternion channel

        # Time matrix: zero padding + stride-2 tap-k selection, precomputed once.
        t_out = (t_cur + 2 * pad - K) // 2 + 1
        tk = np.zeros((K, t_cur, t_out), np.float32)
        for k in range(K):
            for t in range(t_out):
                src = 2 * t + k - pad
                if 0 <= src < t_cur:
                    tk[k, src, t] = 1.0

        layers.append(dict(wf=wf, tk=tk, bf=bf, relu=True))
        enc_ref.append(dict(w3d=w3d, b=b, pool=jnp.asarray(pool_w), stride=2, pad=pad, K=K))

        topologies.append(new_edges)
        pooling_lists.append(pooling_list)
        edge_num.append(len(new_edges) + 1)
        t_cur = t_out

    lat_shape = (layers[-1]['wf'].shape[1], t_cur)

    # ---------------- Decoder layers ----------------
    for i in range(num_layers):
        in_ch = channel_list[num_layers - i]
        out_ch = in_ch // 2
        neighbor_list = find_neighbor(topologies[num_layers - i - 1], skeleton_dist)
        unpool_w = build_skeleton_unpool(pooling_lists[num_layers - i - 1],
                                         in_ch // len(neighbor_list))
        w3d, b = init_conv_params(keys[num_layers + i], neighbor_list, in_ch, out_ch,
                                  edge_num[num_layers - i - 1], K)
        bias_flag = (i == 0) or (i == num_layers - 1)
        if not bias_flag:
            b = jnp.zeros_like(b)           # bias=False case
        relu = (i != num_layers - 1)

        # Fold unpool into conv weights (per tap).
        w_np, b_np = np.asarray(w3d), np.asarray(b)
        wf = np.einsum('oik,ic->koc', w_np, unpool_w).astype(np.float32)  # (K, Cout, Cprev)
        bf = b_np.astype(np.float32)
        if i == num_layers - 1:
            wf = wf[:, :-1, :]              # fold the final "[:, :-1, :]" channel drop
            bf = bf[:-1]

        # Time matrix: linear x2 upsample + zero pad + tap-k shift, precomputed once.
        t_up = 2 * t_cur
        U = build_upsample_matrix(t_cur, 2)
        u_pad = np.zeros((t_cur, t_up + 2 * pad), np.float32)
        u_pad[:, pad:pad + t_up] = U
        t_out = t_up + 2 * pad - K + 1
        tk = np.stack([u_pad[:, k:k + t_out] for k in range(K)], axis=0)

        layers.append(dict(wf=wf, tk=tk, bf=bf, relu=relu))
        dec_ref.append(dict(unpool=jnp.asarray(unpool_w), w3d=w3d, b=b, pad=pad, K=K, relu=relu))
        t_cur = t_out

    out_shape = (layers[-1]['wf'].shape[1], t_cur)

    # ------------- Extra fold: one (Cin*Tin, Cout*Tout) matrix per layer, 128-padded -------------
    flat_dims = [layers[0]['wf'].shape[2] * layers[0]['tk'].shape[1]]
    for lyr in layers:
        flat_dims.append(lyr['wf'].shape[1] * lyr['tk'].shape[2])
    padded = [_round_up(d, 128) for d in flat_dims]
    m_bytes = sum(padded[i] * padded[i + 1] * 4 for i in range(len(padded) - 1))
    # 2x: the constant operands are double-buffered by the pipeline. Conservative so the
    # folded path stays well inside every generation's scoped-VMEM default (16 MiB on v5e).
    folded = (2 * m_bytes) <= fold_vmem_budget_bytes

    fused_layers = []
    for li, lyr in enumerate(layers):
        wf, tk, bf = lyr['wf'], lyr['tk'], lyr['bf']
        entry = dict(w=jnp.asarray(wf), t=jnp.asarray(tk),
                     b=jnp.asarray(bf).reshape(-1, 1), relu=lyr['relu'],
                     m=None, bflat=None)
        if folded:
            d_in = wf.shape[2] * tk.shape[1]
            d_out = wf.shape[1] * tk.shape[2]
            p_in, p_out = padded[li], padded[li + 1]
            # M[i*Tin+t, o*Tout+u] = sum_k W_k[o,i] * T_k[t,u]
            m = np.einsum('koi,ktu->itou', wf, tk).reshape(d_in, d_out).astype(np.float32)
            m_pad = np.zeros((p_in, p_out), np.float32)
            m_pad[:d_in, :d_out] = m
            b_pad = np.zeros((1, p_out), np.float32)
            b_pad[0, :d_out] = np.repeat(bf, tk.shape[2])
            entry['m'] = jnp.asarray(m_pad)
            entry['bflat'] = jnp.asarray(b_pad)
        fused_layers.append(entry)

    fused = dict(layers=fused_layers, num_enc=num_layers, folded=folded,
                 lat_shape=lat_shape, out_shape=out_shape)
    return enc_ref, dec_ref, fused


# ----------------------------------------------------------------------------
# Pure-JAX reference (lax.conv, explicit pool/unpool/upsample) to validate the Pallas paths.
# ----------------------------------------------------------------------------
def ae_forward_ref(enc_layers, dec_layers, x):
    x = jnp.concatenate([x, jnp.zeros_like(x[:, :1, :])], axis=1)
    for lyr in enc_layers:
        conv = jax.lax.conv_general_dilated(
            x, lyr['w3d'], window_strides=(lyr['stride'],),
            padding=[(lyr['pad'], lyr['pad'])],
            dimension_numbers=('NCH', 'OIH', 'NCH'), precision=HIGH)
        conv = conv + lyr['b'][None, :, None]
        pooled = jnp.einsum('pc,bct->bpt', lyr['pool'], conv, precision=HIGH)
        x = jnp.where(pooled >= 0, pooled, 0.2 * pooled)
    latent = x
    for lyr in dec_layers:
        U = jnp.asarray(build_upsample_matrix(x.shape[2], 2))
        x = jnp.einsum('bct,tu->bcu', x, U, precision=HIGH)
        x = jnp.einsum('pc,bct->bpt', lyr['unpool'], x, precision=HIGH)
        conv = jax.lax.conv_general_dilated(
            x, lyr['w3d'], window_strides=(1,), padding=[(lyr['pad'], lyr['pad'])],
            dimension_numbers=('NCH', 'OIH', 'NCH'), precision=HIGH)
        conv = conv + lyr['b'][None, :, None]
        x = jnp.where(conv >= 0, conv, 0.2 * conv) if lyr['relu'] else conv
    return latent, x[:, :-1, :]


if __name__ == "__main__":
    # Small skeleton: 7 joints, 6 edges, two 3-edge chains from the root.
    topology = [(0, 1), (1, 2), (2, 3), (0, 4), (4, 5), (5, 6)]
    num_layers, kernel_size, skeleton_dist = 2, 3, 1

    B, T = 2, 16
    in_channels = 4 * len(topology) + 3       # quaternion per edge + 3D root position

    key = jax.random.PRNGKey(0)
    k_params, k_x = jax.random.split(key)
    enc_layers, dec_layers, fused = build_ae(k_params, topology, T, num_layers,
                                             kernel_size, skeleton_dist)
    x = jax.random.normal(k_x, (B, in_channels, T), jnp.float32)

    latent_ref_o, result_ref_o = ae_forward_ref(enc_layers, dec_layers, x)

    # Kernel matmuls run at default (bf16-pass) MXU precision while the reference uses
    # HIGHEST, so tolerances are looser than before (still far below any real-bug error).
    RTOL, ATOL = 3e-2, 3e-2

    # Fast path: fully folded, one lane-dense matmul per layer, whole AE in one pallas_call.
    assert fused['folded']
    latent, result = ae_forward(fused, x)
    latent, result = jax.block_until_ready((latent, result))
    np.testing.assert_allclose(np.asarray(latent), np.asarray(latent_ref_o), rtol=RTOL, atol=ATOL)
    np.testing.assert_allclose(np.asarray(result), np.asarray(result_ref_o), rtol=RTOL, atol=ATOL)

    # Fallback path: factored per-tap kernel (used automatically when the folded constants
    # would exceed the VMEM budget at large T) — exercised and validated here as well.
    latent_f, result_f = ae_forward(fused, x, force_factored=True)
    latent_f, result_f = jax.block_until_ready((latent_f, result_f))
    np.testing.assert_allclose(np.asarray(latent_f), np.asarray(latent_ref_o), rtol=RTOL, atol=ATOL)
    np.testing.assert_allclose(np.asarray(result_f), np.asarray(result_ref_o), rtol=RTOL, atol=ATOL)

    assert latent.shape == (B, 48, T // 4)
    assert result.shape == (B, in_channels, T)
    print("KERNEL_OK")
</pallas_src>

<mosaic_0001>
module attributes {stable_mosaic.version = 11 : i64} {
  func.func @kernel(%arg0: i32, %arg1: memref<1x8x512xf32, #tpu.memory_space<vmem>>, %arg2: memref<512x384xf32, #tpu.memory_space<vmem>>, %arg3: memref<1x384xf32, #tpu.memory_space<vmem>>, %arg4: memref<384x256xf32, #tpu.memory_space<vmem>>, %arg5: memref<1x256xf32, #tpu.memory_space<vmem>>, %arg6: memref<256x384xf32, #tpu.memory_space<vmem>>, %arg7: memref<1x384xf32, #tpu.memory_space<vmem>>, %arg8: memref<384x512xf32, #tpu.memory_space<vmem>>, %arg9: memref<1x512xf32, #tpu.memory_space<vmem>>, %arg10: memref<1x8x256xf32, #tpu.memory_space<vmem>>, %arg11: memref<1x8x512xf32, #tpu.memory_space<vmem>>) attributes {dimension_semantics = [#tpu.dimension_semantics<parallel>], iteration_bounds = array<i64: 2>, scalar_prefetch = 0 : i64, scratch_operands = 0 : i64, tpu.core_type = #tpu.core_type<tc>, window_params = [{transform_indices = @transform_0, window_bounds = array<i64: 1, 8, 512>}, {pipeline_mode = #tpu.pipeline_mode<synchronous>, transform_indices = @transform_1, window_bounds = array<i64: 512, 384>}, {pipeline_mode = #tpu.pipeline_mode<synchronous>, transform_indices = @transform_2, window_bounds = array<i64: 1, 384>}, {pipeline_mode = #tpu.pipeline_mode<synchronous>, transform_indices = @transform_3, window_bounds = array<i64: 384, 256>}, {pipeline_mode = #tpu.pipeline_mode<synchronous>, transform_indices = @transform_4, window_bounds = array<i64: 1, 256>}, {pipeline_mode = #tpu.pipeline_mode<synchronous>, transform_indices = @transform_5, window_bounds = array<i64: 256, 384>}, {pipeline_mode = #tpu.pipeline_mode<synchronous>, transform_indices = @transform_6, window_bounds = array<i64: 1, 384>}, {pipeline_mode = #tpu.pipeline_mode<synchronous>, transform_indices = @transform_7, window_bounds = array<i64: 384, 512>}, {pipeline_mode = #tpu.pipeline_mode<synchronous>, transform_indices = @transform_8, window_bounds = array<i64: 1, 512>}, {transform_indices = @transform_9, window_bounds = array<i64: 1, 8, 256>}, {transform_indices = @transform_10, window_bounds = array<i64: 1, 8, 512>}]} {
    %c0 = arith.constant 0 : index
    %c0_0 = arith.constant 0 : index
    %c0_1 = arith.constant 0 : index
    %0 = vector.load %arg1[%c0, %c0_0, %c0_1] : memref<1x8x512xf32, #tpu.memory_space<vmem>>, vector<1x8x512xf32>
    %1 = vector.shape_cast %0 : vector<1x8x512xf32> to vector<8x512xf32>
    %c0_2 = arith.constant 0 : index
    %c0_3 = arith.constant 0 : index
    %2 = vector.load %arg2[%c0_2, %c0_3] : memref<512x384xf32, #tpu.memory_space<vmem>>, vector<512x384xf32>
    %c0_4 = arith.constant 0 : index
    %c0_5 = arith.constant 0 : index
    %3 = vector.load %arg3[%c0_4, %c0_5] : memref<1x384xf32, #tpu.memory_space<vmem>>, vector<1x384xf32>
    %cst = arith.constant dense<0.000000e+00> : vector<8x384xf32>
    %4 = tpu.matmul %1, %2, %cst {dimension_numbers = #tpu.dot_dimension_numbers<[1], [0], [0], [1], [0, 0, 1, 1], [], []>} : vector<8x512xf32>, vector<512x384xf32>, vector<8x384xf32> -> vector<8x384xf32>
    %5 = vector.broadcast %3 : vector<1x384xf32> to vector<8x384xf32>
    %6 = arith.addf %4, %5 : vector<8x384xf32>
    %cst_6 = arith.constant 0.000000e+00 : f32
    %7 = vector.broadcast %cst_6 : f32 to vector<8x384xf32>
    %8 = arith.cmpf oge, %6, %7 : vector<8x384xf32>
    %cst_7 = arith.constant 2.000000e-01 : f32
    %9 = vector.broadcast %cst_7 : f32 to vector<8x384xf32>
    %10 = arith.mulf %9, %6 : vector<8x384xf32>
    %11 = arith.select %8, %6, %10 : vector<8x384xi1>, vector<8x384xf32>
    %c0_8 = arith.constant 0 : index
    %c0_9 = arith.constant 0 : index
    %12 = vector.load %arg4[%c0_8, %c0_9] : memref<384x256xf32, #tpu.memory_space<vmem>>, vector<384x256xf32>
    %c0_10 = arith.constant 0 : index
    %c0_11 = arith.constant 0 : index
    %13 = vector.load %arg5[%c0_10, %c0_11] : memref<1x256xf32, #tpu.memory_space<vmem>>, vector<1x256xf32>
    %cst_12 = arith.constant dense<0.000000e+00> : vector<8x256xf32>
    %14 = tpu.matmul %11, %12, %cst_12 {dimension_numbers = #tpu.dot_dimension_numbers<[1], [0], [0], [1], [0, 0, 1, 1], [], []>} : vector<8x384xf32>, vector<384x256xf32>, vector<8x256xf32> -> vector<8x256xf32>
    %15 = vector.broadcast %13 : vector<1x256xf32> to vector<8x256xf32>
    %16 = arith.addf %14, %15 : vector<8x256xf32>
    %cst_13 = arith.constant 0.000000e+00 : f32
    %17 = vector.broadcast %cst_13 : f32 to vector<8x256xf32>
    %18 = arith.cmpf oge, %16, %17 : vector<8x256xf32>
    %cst_14 = arith.constant 2.000000e-01 : f32
    %19 = vector.broadcast %cst_14 : f32 to vector<8x256xf32>
    %20 = arith.mulf %19, %16 : vector<8x256xf32>
    %21 = arith.select %18, %16, %20 : vector<8x256xi1>, vector<8x256xf32>
    %c0_15 = arith.constant 0 : index
    %c0_16 = arith.constant 0 : index
    %c0_17 = arith.constant 0 : index
    %22 = vector.load %arg10[%c0_15, %c0_16, %c0_17] : memref<1x8x256xf32, #tpu.memory_space<vmem>>, vector<1x8x256xf32>
    %23 = vector.shape_cast %22 : vector<1x8x256xf32> to vector<8x256xf32>
    %24 = vector.shape_cast %21 : vector<8x256xf32> to vector<1x8x256xf32>
    tpu.vector_store %arg10[%c0_15, %c0_16, %c0_17], %24 {strides = array<i32>} : memref<1x8x256xf32, #tpu.memory_space<vmem>>, vector<1x8x256xf32>,
    %c0_18 = arith.constant 0 : index
    %c0_19 = arith.constant 0 : index
    %25 = vector.load %arg6[%c0_18, %c0_19] : memref<256x384xf32, #tpu.memory_space<vmem>>, vector<256x384xf32>
    %c0_20 = arith.constant 0 : index
    %c0_21 = arith.constant 0 : index
    %26 = vector.load %arg7[%c0_20, %c0_21] : memref<1x384xf32, #tpu.memory_space<vmem>>, vector<1x384xf32>
    %cst_22 = arith.constant dense<0.000000e+00> : vector<8x384xf32>
    %27 = tpu.matmul %21, %25, %cst_22 {dimension_numbers = #tpu.dot_dimension_numbers<[1], [0], [0], [1], [0, 0, 1, 1], [], []>} : vector<8x256xf32>, vector<256x384xf32>, vector<8x384xf32> -> vector<8x384xf32>
    %28 = vector.broadcast %26 : vector<1x384xf32> to vector<8x384xf32>
    %29 = arith.addf %27, %28 : vector<8x384xf32>
    %cst_23 = arith.constant 0.000000e+00 : f32
    %30 = vector.broadcast %cst_23 : f32 to vector<8x384xf32>
    %31 = arith.cmpf oge, %29, %30 : vector<8x384xf32>
    %cst_24 = arith.constant 2.000000e-01 : f32
    %32 = vector.broadcast %cst_24 : f32 to vector<8x384xf32>
    %33 = arith.mulf %32, %29 : vector<8x384xf32>
    %34 = arith.select %31, %29, %33 : vector<8x384xi1>, vector<8x384xf32>
    %c0_25 = arith.constant 0 : index
    %c0_26 = arith.constant 0 : index
    %35 = vector.load %arg8[%c0_25, %c0_26] : memref<384x512xf32, #tpu.memory_space<vmem>>, vector<384x512xf32>
    %c0_27 = arith.constant 0 : index
    %c0_28 = arith.constant 0 : index
    %36 = vector.load %arg9[%c0_27, %c0_28] : memref<1x512xf32, #tpu.memory_space<vmem>>, vector<1x512xf32>
    %cst_29 = arith.constant dense<0.000000e+00> : vector<8x512xf32>
    %37 = tpu.matmul %34, %35, %cst_29 {dimension_numbers = #tpu.dot_dimension_numbers<[1], [0], [0], [1], [0, 0, 1, 1], [], []>} : vector<8x384xf32>, vector<384x512xf32>, vector<8x512xf32> -> vector<8x512xf32>
    %38 = vector.broadcast %36 : vector<1x512xf32> to vector<8x512xf32>
    %39 = arith.addf %37, %38 : vector<8x512xf32>
    %c0_30 = arith.constant 0 : index
    %c0_31 = arith.constant 0 : index
    %c0_32 = arith.constant 0 : index
    %40 = vector.load %arg11[%c0_30, %c0_31, %c0_32] : memref<1x8x512xf32, #tpu.memory_space<vmem>>, vector<1x8x512xf32>
    %41 = vector.shape_cast %40 : vector<1x8x512xf32> to vector<8x512xf32>
    %42 = vector.shape_cast %39 : vector<8x512xf32> to vector<1x8x512xf32>
    tpu.vector_store %arg11[%c0_30, %c0_31, %c0_32], %42 {strides = array<i32>} : memref<1x8x512xf32, #tpu.memory_space<vmem>>, vector<1x8x512xf32>,
    return
  }
  func.func @transform_0(%arg0: i32) -> (i32, i32, i32) {
    %c0_i32 = arith.constant 0 : i32
    %c0_i32_0 = arith.constant 0 : i32
    %c0_i32_1 = arith.constant 0 : i32
    return %arg0, %c0_i32, %c0_i32_0 : i32, i32, i32
  }
  func.func @transform_1(%arg0: i32) -> (i32, i32) {
    %c0_i32 = arith.constant 0 : i32
    %c0_i32_0 = arith.constant 0 : i32
    %c0_i32_1 = arith.constant 0 : i32
    return %c0_i32, %c0_i32_0 : i32, i32
  }
  func.func @transform_2(%arg0: i32) -> (i32, i32) {
    %c0_i32 = arith.constant 0 : i32
    %c0_i32_0 = arith.constant 0 : i32
    %c0_i32_1 = arith.constant 0 : i32
    return %c0_i32, %c0_i32_0 : i32, i32
  }
  func.func @transform_3(%arg0: i32) -> (i32, i32) {
    %c0_i32 = arith.constant 0 : i32
    %c0_i32_0 = arith.constant 0 : i32
    %c0_i32_1 = arith.constant 0 : i32
    return %c0_i32, %c0_i32_0 : i32, i32
  }
  func.func @transform_4(%arg0: i32) -> (i32, i32) {
    %c0_i32 = arith.constant 0 : i32
    %c0_i32_0 = arith.constant 0 : i32
    %c0_i32_1 = arith.constant 0 : i32
    return %c0_i32, %c0_i32_0 : i32, i32
  }
  func.func @transform_5(%arg0: i32) -> (i32, i32) {
    %c0_i32 = arith.constant 0 : i32
    %c0_i32_0 = arith.constant 0 : i32
    %c0_i32_1 = arith.constant 0 : i32
    return %c0_i32, %c0_i32_0 : i32, i32
  }
  func.func @transform_6(%arg0: i32) -> (i32, i32) {
    %c0_i32 = arith.constant 0 : i32
    %c0_i32_0 = arith.constant 0 : i32
    %c0_i32_1 = arith.constant 0 : i32
    return %c0_i32, %c0_i32_0 : i32, i32
  }
  func.func @transform_7(%arg0: i32) -> (i32, i32) {
    %c0_i32 = arith.constant 0 : i32
    %c0_i32_0 = arith.constant 0 : i32
    %c0_i32_1 = arith.constant 0 : i32
    return %c0_i32, %c0_i32_0 : i32, i32
  }
  func.func @transform_8(%arg0: i32) -> (i32, i32) {
    %c0_i32 = arith.constant 0 : i32
    %c0_i32_0 = arith.constant 0 : i32
    %c0_i32_1 = arith.constant 0 : i32
    return %c0_i32, %c0_i32_0 : i32, i32
  }
  func.func @transform_9(%arg0: i32) -> (i32, i32, i32) {
    %c0_i32 = arith.constant 0 : i32
    %c0_i32_0 = arith.constant 0 : i32
    %c0_i32_1 = arith.constant 0 : i32
    return %arg0, %c0_i32, %c0_i32_0 : i32, i32, i32
  }
  func.func @transform_10(%arg0: i32) -> (i32, i32, i32) {
    %c0_i32 = arith.constant 0 : i32
    %c0_i32_0 = arith.constant 0 : i32
    %c0_i32_1 = arith.constant 0 : i32
    return %arg0, %c0_i32, %c0_i32_0 : i32, i32, i32
  }
}

</mosaic_0001>

<bundles_post_ra>
// kernel: tpu_custom_call.1
= control target key start
LH: loop header
LB: loop body
LE: loop exit
PB: predicated region body
PF: predicated region fallthrough
CT: control target
= control target key end

     0   :  { %s2844_s0 = inlined_call_operand.hbm [shape: f32[2,8,512], index: 0, kind: input, shape index: {}]   ;;  %s2845_s1 = inlined_call_operand.hbm [shape: f32[512,384], index: 1, kind: input, shape index: {}]   ;;  %s2846_s2 = inlined_call_operand.hbm [shape: f32[1,384], index: 2, kind: input, shape index: {}]   ;;  %s2847_s3 = inlined_call_operand.hbm [shape: f32[384,256], index: 3, kind: input, shape index: {}]   ;;  %s2848_s4 = inlined_call_operand.hbm [shape: f32[1,256], index: 4, kind: input, shape index: {}]   ;;  %s2849_s5 = inlined_call_operand.hbm [shape: f32[256,384], index: 5, kind: input, shape index: {}]   ;;  %s2850_s6 = inlined_call_operand.vmem [shape: f32[1,384], index: 6, kind: input, shape index: {}]   ;;  %s2851_s7 = inlined_call_operand.hbm [shape: f32[384,512], index: 7, kind: input, shape index: {}]   ;;  %s2852_s8 = inlined_call_operand.vmem [shape: f32[1,512], index: 8, kind: input, shape index: {}]   ;;  %s2853_s9 = inlined_call_operand.hbm [shape: f32[2,8,256], index: 9, kind: output, shape index: {0}]   ;;  %s2854_s10 = inlined_call_operand.hbm [shape: f32[2,8,512], index: 10, kind: output, shape index: {1}]  }
   0x1   :  { %2857 = sst [smem:[#allocation23_spill]] %s2845_s1 }
   0x2   :  { %2858 = sst [smem:[#allocation24_spill]] %s2846_s2 }
   0x3   :  { %2859 = sst [smem:[#allocation25_spill]] %s2847_s3 }
   0x4   :  { %2860 = sst [smem:[#allocation26_spill]] %s2852_s8 }
   0x5   :  { %2861 = sst [smem:[#allocation27_spill]] %s2854_s10 }
   0x6   :  { %16 = vsyncpa [#allocation3], 0 }
   0x7   :  { %18 = vsyncpa [#allocation3 + $0x1], 0 }
   0x8   :  { %19 = vsyncpa [#allocation6], 0 }
   0x9   :  { %20 = vsyncpa [#allocation9], 0 }
   0xa   :  { %21 = vsyncpa [#allocation12], 0 }
   0xb   :  { %22 = vsyncpa [#allocation4], 0 }
   0xc   :  { %24 = vsyncpa [#allocation4 + $0x1], 0 }
   0xd   :  { %25 = vsyncpa [#allocation16], 0 }
   0xe   :  { %27 = vsyncpa [#allocation16 + $0x1], 0  ;;  %s2583_s13 = smov 0   ;;  %s2585_s14 = smov 0  }
   0xf   :  { %s2587_s15 = smov 0   ;;  %s2589_s16 = smov 0  }
  0x10 LB: > { %s2862_s1 = sld [smem:[#allocation23_spill]]  ;;  %s2607_s20 = sadd.s32 4294967295, %s2514_s16   ;;  %s2514_s16 = sphi %s2589_s16, %s2879_s16   ;;  %s2510_s15 = sphi %s2587_s15, %s2878_s15   ;;  %s2506_s14 = sphi %s2585_s14, %s2877_s14   ;;  %s2502_s13 = sphi %s2583_s13, %s2876_s13  }
  0x11   : > { %p2044_p0 = scmp.ge.s32.totalorder %s2514_s16, 1  ;;  %p54_p1 = scmp.eq.s32.totalorder %s2607_s20, 0 }
  0x12   : > { %p284_p2 = scmp.lt.s32.totalorder %s2514_s16, 3  ;;  %s2516_s22 = smov [#allocation5]  }
  0x13   : > { %s297_s23 = sshll.u32 %s2516_s22, 4  ;;  %s2864_s3 = sld [smem:[#allocation25_spill]]  ;;  %s298_s23 = int_to_ptr.vmem [resolvable:$true] %s297_s23 }
  0x14   : > { %p2612_p3 = pnand %p2044_p0, %p284_p2  ;;  %s2517_s28 = smov [#allocation8]  }
  0x15   : > { %s323_s29 = sshll.u32 %s2517_s28, 4  ;;  %s2518_s30 = smov 384   ;;  %s324_s29 = int_to_ptr.vmem [resolvable:$true] %s323_s29 }
  0x16   : > { %s295_s19 = sshll.u32 %s2862_s1, 4  ;;  %p2106_p4 = pneg %p2612_p3  ;;  %s296_s19 = int_to_ptr.hbm [resolvable:$true] %s295_s19 }
  0x17   : > { %s2519_s11 = smov 24   ;;  %s2520_s12 = smov 256  }
  0x18   : > { %p2624_p6 = pnand %p2106_p4, %p54_p1  ;;  %s2521_s17 = smov 16  }
  0x19   : > { %s321_s26 = sshll.u32 %s2864_s3, 4  ;;  %s347_s24 = sshll.u32 %s2849_s5, 4  ;;  %s322_s26 = int_to_ptr.hbm [resolvable:$true] %s321_s26  ;;  %s348_s24 = int_to_ptr.hbm [resolvable:$true] %s347_s24 }
  0x1a   : > { %2109 = dma.hbm_to_vmem [thread:$0]  (!%p2624_p6), %s296_s19, 24576, %s298_s23, [#allocation6], %s2518_s30, %s2518_s30, %s2519_s11  }
  0x1b   : > { %2115 = dma.hbm_to_vmem [thread:$0]  (!%p2624_p6), %s322_s26, 12288, %s324_s29, [#allocation9], %s2520_s12, %s2520_s12, %s2521_s17  }
  0x1c   : > { %s2522_s25 = smov [#allocation11]   ;;  %s2866_s2 = sld [smem:[#allocation24_spill]] }
  0x1d   : > { %s349_s1 = sshll.u32 %s2522_s25, 4  ;;  %s2523_s19 = smov [#allocation7]   ;;  %s350_s1 = int_to_ptr.vmem [resolvable:$true] %s349_s1 }
  0x1e   : > { %2121 = dma.hbm_to_vmem [thread:$0]  (!%p2624_p6), %s348_s24, 12288, %s350_s1, [#allocation12], %s2518_s30, %s2518_s30, %s2519_s11  }
  0x1f   : > { %s312_s23 = sshll.u32 %s2523_s19, 4  ;;  %s336_s29 = sshll.u32 %s2848_s4, 4  ;;  %s313_s23 = int_to_ptr.vmem [resolvable:$true] %s312_s23  ;;  %s337_s29 = int_to_ptr.hbm [resolvable:$true] %s336_s29 }
  0x20   : > { %s364_s1 = sshll.u32 %s2851_s7, 4  ;;  %s2524_s30 = smov [#allocation10]   ;;  %s365_s1 = int_to_ptr.hbm [resolvable:$true] %s364_s1 }
  0x21   : > { %s338_s11 = sshll.u32 %s2524_s30, 4  ;;  %s2525_s8 = smov [#allocation13]   ;;  %s339_s11 = int_to_ptr.vmem [resolvable:$true] %s338_s11 }
  0x22   : > { %s310_s10 = sshll.u32 %s2866_s2, 4  ;;  %s2526_s17 = smov 512   ;;  %s311_s10 = int_to_ptr.hbm [resolvable:$true] %s310_s10 }
  0x23   : > { %2112 = dma.hbm_to_vmem [thread:$0]  (!%p2624_p6), %s311_s10, 48, %s313_s23, [#allocation6]  }
  0x24   : > { %2118 = dma.hbm_to_vmem [thread:$0]  (!%p2624_p6), %s337_s29, 32, %s339_s11, [#allocation9]  }
  0x25   : > { %s366_s10 = sshll.u32 %s2525_s8, 4  ;;  %s2527_s18 = smov 32   ;;  %s367_s10 = int_to_ptr.vmem [resolvable:$true] %s366_s10 }
  0x26   : > { %2124 = dma.hbm_to_vmem [thread:$0]  (!%p2624_p6), %s365_s1, 24576, %s367_s10, [#allocation12], %s2526_s17, %s2526_s17, %s2527_s18  }
  0x27   : > { %s2043_s22 = sadd.s32 4294967294, %s2514_s16   ;;  %s2654_s24 = sadd.s32 1, %s2514_s16  }
  0x28   : > { %s37_s25 = ssub.s32 %s2514_s16, %s2654_s24  ;;  %s40_s28 = sadd.s32 1, %s2510_s15 }
  0x29   : > { %p38_p7 = scmp.eq.s32.totalorder %s37_s25, 0  ;;  %p47_p8 = scmp.ne.s32.totalorder %s2510_s15, %s2506_s14 }
  0x2a   : > { %p48_p9 = scmp.eq.s32.totalorder %s2514_s16, 0  ;;  %p53_p10 = scmp.ne.s32.totalorder %s2506_s14, %s2502_s13 }
  0x2b   : > { %s2665_s19 = scalar_select %p38_p7, %s2510_s15, %s40_s28  }
  0x2c   : > { %p2667_p11 = por %p48_p9, %p47_p8  ;;  %p2673_p12 = por %p54_p1, %p53_p10 }
  0x2d   : > { %p245_p13 = scmp.eq.s32.totalorder %s2607_s20, 1  ;;  %p251_p0 = scmp.eq.s32.totalorder %s2043_s22, 1 }
  0x2e   : > { %p2142_p2 = scmp.lt.s32.totalorder %s2514_s16, 2  ;;  %s383_s26 = sand.u32 1, %s2510_s15  }
  0x2f   : > { %p2680_p4 = por %p245_p13, %p47_p8  ;;  %p2684_p6 = por %p251_p0, %p53_p10 }
  0x30   : > { %s2052_s3 = sshll.u32 %s383_s26, 5  ;;  %s2073_s1 = sshll.u32 %s2514_s16, 5 }
  0x31   : > { %s392_s8 = scalar_lea.hbm %s2844_s0, %s2073_s1  ;;  %s387_s10 = scalar_lea.vmem [#allocation2], %s2052_s3 }
  0x32   : > { %s396_s17 = sshll.u32 %s387_s10, 4  ;;  %s394_s18 = sshll.u32 %s392_s8, 4  ;;  %s397_s17 = int_to_ptr.vmem [resolvable:$true] %s396_s17  ;;  %s395_s18 = int_to_ptr.hbm [resolvable:$true] %s394_s18 }
  0x33   : > { %p2694_p7 = pnand %p2142_p2, %p2667_p11  ;;  %s384_s25 = scalar_lea.sflag [#allocation3], %s383_s26 }
  0x34   : > { %s2374_s28 = sshra.s32 %s395_s18, 4  ;;  %s2381_s30 = scalar_lea.hbm %s2844_s0, 64  ;;  %s2375_s28 = int_to_ptr.hbm [resolvable:$true] %s2374_s28 }
  0x35   : > { %s2376_s2 = scalar_lea.hbm %s2375_s28, 32  ;;  %p2378_p9 = pneg %p2694_p7 }
  0x36   : > { %p2377_p8 = scmp.ne.s32.totalorder %s2375_s28, %s2376_s2  ;;  %p2382_p11 = scmp.lt.s32.totalorder %s2375_s28, %s2844_s0 }
  0x37   : > { %p2383_p0 = scmp.lt.s32.totalorder %s2381_s30, %s2376_s2 }
  0x38   : > { %p2379_p10 = pnand %p2378_p9, %p2377_p8 }
  0x39   : > { %p2384_p2 = por %p2383_p0, %p2382_p11 }
  0x3a   : > { %p2380_p13 = pneg %p2379_p10 }
  0x3c   : > { %p2385_p5 = pnand %p2384_p2, %p2380_p13 }
  0x3e   : > { %2388 = shalt.err (!%p2385_p5)
}
  0x3f   : > { %2128 = dma.hbm_to_vmem [thread:$0]  (!%p2694_p7), %s395_s18, 512, %s397_s17, %s384_s25  }
  0x40   : > { %405 = sbr.rel (%p2612_p3) target bundleno = 773 (0x305), region = 56  ;;  %s2711_s26 = sand.u32 (!%p2612_p3), 1, %s2506_s14  }
  0x41   : > { %s2856_s8 = sshll.u32 (!%p2612_p3), %s2711_s26, 5  ;;  %s408_s10 = scalar_lea.sflag (!%p2612_p3), [#allocation3], %s2711_s26 }
  0x42   : > { %s2717_s2 = scalar_lea.vmem (!%p2612_p3), [#allocation2], %s2856_s8 }
  0x45   : > { %2477 = dma.done.wait (%p2673_p12), %s408_s10, 512  }
  0x46   : > { %2479 = vsyncadd (%p2673_p12), %s408_s10, 4294966784 }
  0x47   : > { %2481 = dma.done.wait (%p54_p1), [#allocation6], 24624  }
  0x48   : > { %2483 = vsyncadd (%p54_p1), [#allocation6], 4294942672 }
  0x49   : > { %2485 = dma.done.wait (%p54_p1), [#allocation9], 12320  }
  0x4a   : > { %2487 = vsyncadd (%p54_p1), [#allocation9], 4294954976 }
  0x4b   : > { %2489 = dma.done.wait (%p54_p1), [#allocation12], 36864  }
  0x4c   : > { %2491 = vsyncadd (%p54_p1), [#allocation12], 4294930432  ;;  %v629_v0 = vld [vmem:[#allocation5 + $0x468] sm:$0xff]  ;;  %v626_v2 = vld [vmem:[#allocation5 + $0x450] sm:$0xff]  ;;  %s2063_s21 = sshll.u32 %s2711_s26, 4  ;;  %s2074_s22 = sshll.u32 %s2607_s20, 4 }
  0x4d   : > { %v533_v1 = vld [vmem:[#allocation5 + $0x168] sm:$0xff]  ;;  %728 = vmatpush.msra.mxu2 %v629_v0  ;;  %v530_v4 = vld [vmem:[#allocation5 + $0x150] sm:$0xff]  ;;  %v623_v6 = vld [vmem:[#allocation5 + $0x438] sm:$0xff]  ;;  %s2765_s27 = scalar_lea.vmem [#allocation14], %s2063_s21  ;;  %s1863_s3 = scalar_lea.hbm %s2853_s9, %s2074_s22 }
  0x4e   : > { %688 = vmatpush.msra.mxu0 %v533_v1  ;;  %v677_v3 = vld [vmem:[#allocation5 + $0x5e8] sm:$0xff]  ;;  %v674_v7 = vld [vmem:[#allocation5 + $0x5d0] sm:$0xff]  ;;  %v527_v8 = vld [vmem:[#allocation5 + $0x138] sm:$0xff]  ;;  %s1865_s1 = sshll.u32 %s2765_s27, 4  ;;  %s1867_s30 = sshll.u32 %s1863_s3, 4  ;;  %s1866_s1 = int_to_ptr.vmem [resolvable:$true] %s1865_s1  ;;  %s1868_s30 = int_to_ptr.hbm [resolvable:$true] %s1867_s30 }
  0x4f   : > { %v581_v5 = vld [vmem:[#allocation5 + $0x2e8] sm:$0xff]  ;;  %748 = vmatpush.msra.mxu3 %v677_v3  ;;  %729 = vmatpush.msra.mxu2 %v626_v2  ;;  %v578_v9 = vld [vmem:[#allocation5 + $0x2d0] sm:$0xff]  ;;  %v671_v10 = vld [vmem:[#allocation5 + $0x5b8] sm:$0xff]  ;;  %s1847_s11 = scalar_lea.sflag [#allocation4], %s2711_s26  ;;  %s2418_s23 = sshra.s32 %s1868_s30, 4  ;;  %s2419_s23 = int_to_ptr.hbm [resolvable:$true] %s2418_s23 }
  0x50   : > { %708 = vmatpush.msra.mxu1 %v581_v5  ;;  %689 = vmatpush.msra.mxu0 %v530_v4  ;;  %v620_v11 = vld [vmem:[#allocation5 + $0x420] sm:$0xff]  ;;  %v575_v13 = vld [vmem:[#allocation5 + $0x2b8] sm:$0xff]  ;;  %v617_v16 = vld [vmem:[#allocation5 + $0x408] sm:$0xff]  ;;  %s2420_s10 = scalar_lea.hbm %s2419_s23, 16  ;;  %s2424_s17 = scalar_lea.hbm %s2853_s9, 32 }
  0x51   : > { %749 = vmatpush.msra.mxu3 %v674_v7  ;;  %v524_v12 = vld [vmem:[#allocation5 + $0x120] sm:$0xff]  ;;  %730 = vmatpush.msra.mxu2 %v623_v6  ;;  %v521_v17 = vld [vmem:[#allocation5 + $0x108] sm:$0xff]  ;;  %v614_v20 = vld [vmem:[#allocation5 + $0x3f0] sm:$0xff]  ;;  %p2421_p1 = scmp.ne.s32.totalorder %s2419_s23, %s2420_s10  ;;  %p2425_p12 = scmp.lt.s32.totalorder %s2419_s23, %s2853_s9 }
  0x52   : > { %709 = vmatpush.msra.mxu1 %v578_v9  ;;  %690 = vmatpush.msra.mxu0 %v527_v8  ;;  %v668_v14 = vld [vmem:[#allocation5 + $0x5a0] sm:$0xff]  ;;  %v665_v18 = vld [vmem:[#allocation5 + $0x588] sm:$0xff]  ;;  %v518_v21 = vld [vmem:[#allocation5 + $0xf0] sm:$0xff]  ;;  %p2426_p7 = scmp.lt.s32.totalorder %s2424_s17, %s2420_s10 }
  0x53   : > { %v572_v15 = vld [vmem:[#allocation5 + $0x2a0] sm:$0xff]  ;;  %750 = vmatpush.msra.mxu3 %v671_v10  ;;  %731 = vmatpush.msra.mxu2 %v620_v11  ;;  %v569_v19 = vld [vmem:[#allocation5 + $0x288] sm:$0xff]  ;;  %v662_v22 = vld [vmem:[#allocation5 + $0x570] sm:$0xff]  ;;  %p2422_p3 = pnand %p2421_p1, %p2680_p4 }
  0x54   : > { %710 = vmatpush.msra.mxu1 %v575_v13  ;;  %691 = vmatpush.msra.mxu0 %v524_v12  ;;  %v566_v23 = vld [vmem:[#allocation5 + $0x270] sm:$0xff]  ;;  %v611_v24 = vld [vmem:[#allocation5 + $0x3d8] sm:$0xff]  ;;  %v608_v28 = vld [vmem:[#allocation5 + $0x3c0] sm:$0xff]  ;;  %p2427_p8 = por %p2426_p7, %p2425_p12 }
  0x55   : > { %751 = vmatpush.msra.mxu3 %v668_v14  ;;  %732 = vmatpush.msra.mxu2 %v617_v16  ;;  %v515_v25 = vld [vmem:[#allocation5 + $0xd8] sm:$0xff]  ;;  %v512_v29 = vld [vmem:[#allocation5 + $0xc0] sm:$0xff]  ;;  %v605_v32 = vld [vmem:[#allocation5 + $0x3a8] sm:$0xff]  ;;  %p2423_p5 = pneg %p2422_p3 }
  0x56   : > { %711 = vmatpush.msra.mxu1 %v572_v15  ;;  %692 = vmatpush.msra.mxu0 %v521_v17  ;;  %v659_v26 = vld [vmem:[#allocation5 + $0x558] sm:$0xff]  ;;  %v656_v30 = vld [vmem:[#allocation5 + $0x540] sm:$0xff]  ;;  %v509_v33 = vld [vmem:[#allocation5 + $0xa8] sm:$0xff] }
  0x57   : > { %752 = vmatpush.msra.mxu3 %v665_v18  ;;  %733 = vmatpush.msra.mxu2 %v614_v20  ;;  %v563_v27 = vld [vmem:[#allocation5 + $0x258] sm:$0xff]  ;;  %v560_v31 = vld [vmem:[#allocation5 + $0x240] sm:$0xff]  ;;  %v653_v34 = vld [vmem:[#allocation5 + $0x528] sm:$0xff]  ;;  %p2428_p9 = pnand %p2427_p8, %p2423_p5 }
  0x58   : > { %712 = vmatpush.msra.mxu1 %v569_v19  ;;  %693 = vmatpush.msra.mxu0 %v518_v21  ;;  %v557_v35 = vld [vmem:[#allocation5 + $0x228] sm:$0xff]  ;;  %v602_v36 = vld [vmem:[#allocation5 + $0x390] sm:$0xff]  ;;  %v599_v40 = vld [vmem:[#allocation5 + $0x378] sm:$0xff] }
  0x59   : > { %753 = vmatpush.msra.mxu3 %v662_v22  ;;  %734 = vmatpush.msra.mxu2 %v611_v24  ;;  %v506_v37 = vld [vmem:[#allocation5 + $0x90] sm:$0xff]  ;;  %v503_v41 = vld [vmem:[#allocation5 + $0x78] sm:$0xff]  ;;  %v596_v44 = vld [vmem:[#allocation5 + $0x360] sm:$0xff] }
  0x5a   : > { %713 = vmatpush.msra.mxu1 %v566_v23  ;;  %694 = vmatpush.msra.mxu0 %v515_v25  ;;  %v650_v38 = vld [vmem:[#allocation5 + $0x510] sm:$0xff]  ;;  %v647_v42 = vld [vmem:[#allocation5 + $0x4f8] sm:$0xff]  ;;  %v500_v45 = vld [vmem:[#allocation5 + $0x60] sm:$0xff] }
  0x5b   : > { %754 = vmatpush.msra.mxu3 %v659_v26  ;;  %735 = vmatpush.msra.mxu2 %v608_v28  ;;  %v554_v39 = vld [vmem:[#allocation5 + $0x210] sm:$0xff]  ;;  %v551_v43 = vld [vmem:[#allocation5 + $0x1f8] sm:$0xff]  ;;  %v644_v46 = vld [vmem:[#allocation5 + $0x4e0] sm:$0xff] }
  0x5c   : > { %714 = vmatpush.msra.mxu1 %v563_v27  ;;  %695 = vmatpush.msra.mxu0 %v512_v29  ;;  %v548_v47 = vld [vmem:[#allocation5 + $0x1e0] sm:$0xff]  ;;  %v593_v48 = vld [vmem:[#allocation5 + $0x348] sm:$0xff]  ;;  %v590_v52 = vld [vmem:[#allocation5 + $0x330] sm:$0xff] }
  0x5d   : > { %755 = vmatpush.msra.mxu3 %v656_v30  ;;  %736 = vmatpush.msra.mxu2 %v605_v32  ;;  %v497_v49 = vld [vmem:[#allocation5 + $0x48] sm:$0xff]  ;;  %v494_v53 = vld [vmem:[#allocation5 + $0x30] sm:$0xff]  ;;  %v587_v56 = vld [vmem:[#allocation5 + $0x318] sm:$0xff] }
  0x5e   : > { %715 = vmatpush.msra.mxu1 %v560_v31  ;;  %696 = vmatpush.msra.mxu0 %v509_v33  ;;  %v641_v50 = vld [vmem:[#allocation5 + $0x4c8] sm:$0xff]  ;;  %v638_v54 = vld [vmem:[#allocation5 + $0x4b0] sm:$0xff]  ;;  %v491_v57 = vld [vmem:[#allocation5 + $0x18] sm:$0xff] }
  0x5f   : > { %756 = vmatpush.msra.mxu3 %v653_v34  ;;  %737 = vmatpush.msra.mxu2 %v602_v36  ;;  %v545_v51 = vld [vmem:[#allocation5 + $0x1c8] sm:$0xff]  ;;  %v542_v55 = vld [vmem:[#allocation5 + $0x1b0] sm:$0xff]  ;;  %v635_v58 = vld [vmem:[#allocation5 + $0x498] sm:$0xff] }
  0x60   : > { %716 = vmatpush.msra.mxu1 %v557_v35  ;;  %697 = vmatpush.msra.mxu0 %v506_v37  ;;  %v539_v59 = vld [vmem:[#allocation5 + $0x198] sm:$0xff]  ;;  %v584_v60 = vld [vmem:[#allocation5 + $0x300] sm:$0xff]  ;;  %v630_v62 = vld [vmem:[#allocation5 + $0x470] sm:$0xff] }
  0x61   : > { %757 = vmatpush.msra.mxu3 %v650_v38  ;;  %738 = vmatpush.msra.mxu2 %v599_v40  ;;  %v488_v61 = vld [vmem:[#allocation5] sm:$0xff]  ;;  %v534_v0 = vld [vmem:[#allocation5 + $0x170] sm:$0xff]  ;;  %v627_v2 = vld [vmem:[#allocation5 + $0x458] sm:$0xff] }
  0x62   : > { %717 = vmatpush.msra.mxu1 %v554_v39  ;;  %698 = vmatpush.msra.mxu0 %v503_v41  ;;  %v632_v63 = vld [vmem:[#allocation5 + $0x480] sm:$0xff]  ;;  %v678_v1 = vld [vmem:[#allocation5 + $0x5f0] sm:$0xff]  ;;  %v531_v4 = vld [vmem:[#allocation5 + $0x158] sm:$0xff] }
  0x63   : > { %758 = vmatpush.msra.mxu3 %v647_v42  ;;  %739 = vmatpush.msra.mxu2 %v596_v44  ;;  %v536_v3 = vld [vmem:[#allocation5 + $0x180] sm:$0xff]  ;;  %v582_v5 = vld [vmem:[#allocation5 + $0x2f0] sm:$0xff]  ;;  %v675_v7 = vld [vmem:[#allocation5 + $0x5d8] sm:$0xff] }
  0x64   : > { %718 = vmatpush.msra.mxu1 %v551_v43  ;;  %699 = vmatpush.msra.mxu0 %v500_v45  ;;  %v624_v6 = vld [vmem:[#allocation5 + $0x440] sm:$0xff]  ;;  %v579_v9 = vld [vmem:[#allocation5 + $0x2d8] sm:$0xff]  ;;  %v621_v10 = vld [vmem:[#allocation5 + $0x428] sm:$0xff] }
  0x65   : > { %759 = vmatpush.msra.mxu3 %v644_v46  ;;  %740 = vmatpush.msra.mxu2 %v593_v48  ;;  %v528_v8 = vld [vmem:[#allocation5 + $0x140] sm:$0xff]  ;;  %v525_v12 = vld [vmem:[#allocation5 + $0x128] sm:$0xff]  ;;  %v618_v14 = vld [vmem:[#allocation5 + $0x410] sm:$0xff] }
  0x66   : > { %719 = vmatpush.msra.mxu1 %v548_v47  ;;  %700 = vmatpush.msra.mxu0 %v497_v49  ;;  %v672_v11 = vld [vmem:[#allocation5 + $0x5c0] sm:$0xff]  ;;  %v669_v15 = vld [vmem:[#allocation5 + $0x5a8] sm:$0xff]  ;;  %v522_v16 = vld [vmem:[#allocation5 + $0x110] sm:$0xff] }
  0x67   : > { %760 = vmatpush.msra.mxu3 %v641_v50  ;;  %741 = vmatpush.msra.mxu2 %v590_v52  ;;  %v576_v13 = vld [vmem:[#allocation5 + $0x2c0] sm:$0xff]  ;;  %v573_v17 = vld [vmem:[#allocation5 + $0x2a8] sm:$0xff]  ;;  %v615_v18 = vld [vmem:[#allocation5 + $0x3f8] sm:$0xff] }
  0x68   : > { %720 = vmatpush.msra.mxu1 %v545_v51  ;;  %701 = vmatpush.msra.mxu0 %v494_v53  ;;  %v666_v19 = vld [vmem:[#allocation5 + $0x590] sm:$0xff]  ;;  %v519_v20 = vld [vmem:[#allocation5 + $0xf8] sm:$0xff]  ;;  %v612_v22 = vld [vmem:[#allocation5 + $0x3e0] sm:$0xff] }
  0x69   : > { %761 = vmatpush.msra.mxu3 %v638_v54  ;;  %742 = vmatpush.msra.mxu2 %v587_v56  ;;  %v570_v21 = vld [vmem:[#allocation5 + $0x290] sm:$0xff]  ;;  %v663_v23 = vld [vmem:[#allocation5 + $0x578] sm:$0xff]  ;;  %v516_v24 = vld [vmem:[#allocation5 + $0xe0] sm:$0xff] }
  0x6a   : > { %721 = vmatpush.msra.mxu1 %v542_v55  ;;  %702 = vmatpush.msra.mxu0 %v491_v57  ;;  %v567_v25 = vld [vmem:[#allocation5 + $0x278] sm:$0xff]  ;;  %v609_v26 = vld [vmem:[#allocation5 + $0x3c8] sm:$0xff]  ;;  %v660_v27 = vld [vmem:[#allocation5 + $0x560] sm:$0xff] }
  0x6b   : > { %762 = vmatpush.msra.mxu3 %v635_v58  ;;  %743 = vmatpush.msra.mxu2 %v584_v60  ;;  %v513_v28 = vld [vmem:[#allocation5 + $0xc8] sm:$0xff]  ;;  %v564_v29 = vld [vmem:[#allocation5 + $0x260] sm:$0xff]  ;;  %v606_v30 = vld [vmem:[#allocation5 + $0x3b0] sm:$0xff] }
  0x6c   : > { %722 = vmatpush.msra.mxu1 %v539_v59  ;;  %703 = vmatpush.msra.mxu0 %v488_v61  ;;  %v657_v31 = vld [vmem:[#allocation5 + $0x548] sm:$0xff]  ;;  %v510_v32 = vld [vmem:[#allocation5 + $0xb0] sm:$0xff]  ;;  %v603_v34 = vld [vmem:[#allocation5 + $0x398] sm:$0xff] }
  0x6d   : > { %808 = vmatpush.msrb.mxu2 %v630_v62  ;;  %763 = vmatpush.msra.mxu3 %v632_v63  ;;  %v561_v33 = vld [vmem:[#allocation5 + $0x248] sm:$0xff]  ;;  %v654_v35 = vld [vmem:[#allocation5 + $0x530] sm:$0xff]  ;;  %v507_v36 = vld [vmem:[#allocation5 + $0x98] sm:$0xff] }
  0x6e   : > { %768 = vmatpush.msrb.mxu0 %v534_v0  ;;  %723 = vmatpush.msra.mxu1 %v536_v3  ;;  %v558_v37 = vld [vmem:[#allocation5 + $0x230] sm:$0xff]  ;;  %v600_v38 = vld [vmem:[#allocation5 + $0x380] sm:$0xff]  ;;  %v651_v39 = vld [vmem:[#allocation5 + $0x518] sm:$0xff] }
  0x6f   : > { %828 = vmatpush.msrb.mxu3 %v678_v1  ;;  %809 = vmatpush.msrb.mxu2 %v627_v2  ;;  %v504_v40 = vld [vmem:[#allocation5 + $0x80] sm:$0xff]  ;;  %v555_v41 = vld [vmem:[#allocation5 + $0x218] sm:$0xff]  ;;  %v597_v42 = vld [vmem:[#allocation5 + $0x368] sm:$0xff] }
  0x70   : > { %769 = vmatpush.msrb.mxu0 %v531_v4  ;;  %788 = vmatpush.msrb.mxu1 %v582_v5  ;;  %v648_v43 = vld [vmem:[#allocation5 + $0x500] sm:$0xff]  ;;  %v2736_v44 = vld [vmem:[%s2717_s2 + $0x10] sm:$0xff]  ;;  %v501_v45 = vld [vmem:[#allocation5 + $0x68] sm:$0xff] }
  0x71   : > { %810 = vmatpush.msrb.mxu2 %v624_v6  ;;  %829 = vmatpush.msrb.mxu3 %v675_v7  ;;  %v552_v46 = vld [vmem:[#allocation5 + $0x200] sm:$0xff]  ;;  %v594_v47 = vld [vmem:[#allocation5 + $0x350] sm:$0xff]  ;;  %v645_v48 = vld [vmem:[#allocation5 + $0x4e8] sm:$0xff] }
  0x72   : > { %770 = vmatpush.msrb.mxu0 %v528_v8  ;;  %789 = vmatpush.msrb.mxu1 %v579_v9  ;;  %v2739_v49 = vld [vmem:[%s2717_s2] sm:$0xff]  ;;  %v2743_v50 = vld [vmem:[%s2717_s2 + $0x18] sm:$0xff]  ;;  %v498_v51 = vld [vmem:[#allocation5 + $0x50] sm:$0xff] }
  0x73   : > { %811 = vmatpush.msrb.mxu2 %v621_v10  ;;  %830 = vmatpush.msrb.mxu3 %v672_v11  ;;  %v549_v52 = vld [vmem:[#allocation5 + $0x1e8] sm:$0xff]  ;;  %v591_v53 = vld [vmem:[#allocation5 + $0x338] sm:$0xff]  ;;  %v642_v54 = vld [vmem:[#allocation5 + $0x4d0] sm:$0xff] }
  0x74   : > { %771 = vmatpush.msrb.mxu0 %v525_v12  ;;  %790 = vmatpush.msrb.mxu1 %v576_v13  ;;  %v2747_v55 = vld [vmem:[%s2717_s2 + $0x8] sm:$0xff]  ;;  %v495_v56 = vld [vmem:[#allocation5 + $0x38] sm:$0xff]  ;;  %v546_v57 = vld [vmem:[#allocation5 + $0x1d0] sm:$0xff] }
  0x75   : > { %812 = vmatpush.msrb.mxu2 %v618_v14  ;;  %831 = vmatpush.msrb.mxu3 %v669_v15  ;;  %v588_v58 = vld [vmem:[#allocation5 + $0x320] sm:$0xff]  ;;  %v639_v59 = vld [vmem:[#allocation5 + $0x4b8] sm:$0xff]  ;;  %v585_v62 = vld [vmem:[#allocation5 + $0x308] sm:$0xff] }
  0x76   : > { %772 = vmatpush.msrb.mxu0 %v522_v16  ;;  %791 = vmatpush.msrb.mxu1 %v573_v17  ;;  %v492_v60 = vld [vmem:[#allocation5 + $0x20] sm:$0xff]  ;;  %v543_v61 = vld [vmem:[#allocation5 + $0x1b8] sm:$0xff]  ;;  %v489_v0 = vld [vmem:[#allocation5 + $0x8] sm:$0xff] }
  0x77   : > { %813 = vmatpush.msrb.mxu2 %v615_v18  ;;  %832 = vmatpush.msrb.mxu3 %v666_v19  ;;  %v636_v63 = vld [vmem:[#allocation5 + $0x4a0] sm:$0xff]  ;;  %v631_v1 = vld [vmem:[#allocation5 + $0x478] sm:$0xff]  ;;  %v633_v3 = vld [vmem:[#allocation5 + $0x488] sm:$0xff] }
  0x78   : > { %773 = vmatpush.msrb.mxu0 %v519_v20  ;;  %792 = vmatpush.msrb.mxu1 %v570_v21  ;;  %v540_v2 = vld [vmem:[#allocation5 + $0x1a0] sm:$0xff]  ;;  %v535_v4 = vld [vmem:[#allocation5 + $0x178] sm:$0xff]  ;;  %v537_v7 = vld [vmem:[#allocation5 + $0x188] sm:$0xff] }
  0x79   : > { %814 = vmatpush.msrb.mxu2 %v612_v22  ;;  %833 = vmatpush.msrb.mxu3 %v663_v23  ;;  %v628_v5 = vld [vmem:[#allocation5 + $0x460] sm:$0xff]  ;;  %v679_v6 = vld [vmem:[#allocation5 + $0x5f8] sm:$0xff]  ;;  %v625_v9 = vld [vmem:[#allocation5 + $0x448] sm:$0xff] }
  0x7a   : > { %774 = vmatpush.msrb.mxu0 %v516_v24  ;;  %793 = vmatpush.msrb.mxu1 %v567_v25  ;;  %v532_v8 = vld [vmem:[#allocation5 + $0x160] sm:$0xff]  ;;  %v583_v10 = vld [vmem:[#allocation5 + $0x2f8] sm:$0xff]  ;;  %v529_v12 = vld [vmem:[#allocation5 + $0x148] sm:$0xff] }
  0x7b   : > { %815 = vmatpush.msrb.mxu2 %v609_v26  ;;  %834 = vmatpush.msrb.mxu3 %v660_v27  ;;  %v676_v11 = vld [vmem:[#allocation5 + $0x5e0] sm:$0xff]  ;;  %v622_v13 = vld [vmem:[#allocation5 + $0x430] sm:$0xff]  ;;  %v673_v15 = vld [vmem:[#allocation5 + $0x5c8] sm:$0xff] }
  0x7c   : > { %775 = vmatpush.msrb.mxu0 %v513_v28  ;;  %794 = vmatpush.msrb.mxu1 %v564_v29  ;;  %v580_v14 = vld [vmem:[#allocation5 + $0x2e0] sm:$0xff]  ;;  %v526_v16 = vld [vmem:[#allocation5 + $0x130] sm:$0xff]  ;;  %v619_v17 = vld [vmem:[#allocation5 + $0x418] sm:$0xff] }
  0x7d   : > { %816 = vmatpush.msrb.mxu2 %v606_v30  ;;  %835 = vmatpush.msrb.mxu3 %v657_v31  ;;  %v577_v18 = vld [vmem:[#allocation5 + $0x2c8] sm:$0xff]  ;;  %v670_v19 = vld [vmem:[#allocation5 + $0x5b0] sm:$0xff]  ;;  %v523_v20 = vld [vmem:[#allocation5 + $0x118] sm:$0xff] }
  0x7e   : > { %776 = vmatpush.msrb.mxu0 %v510_v32  ;;  %795 = vmatpush.msrb.mxu1 %v561_v33  ;;  %v616_v21 = vld [vmem:[#allocation5 + $0x400] sm:$0xff]  ;;  %v574_v22 = vld [vmem:[#allocation5 + $0x2b0] sm:$0xff]  ;;  %v667_v23 = vld [vmem:[#allocation5 + $0x598] sm:$0xff] }
  0x7f   : > { %817 = vmatpush.msrb.mxu2 %v603_v34  ;;  %836 = vmatpush.msrb.mxu3 %v654_v35  ;;  %v520_v24 = vld [vmem:[#allocation5 + $0x100] sm:$0xff]  ;;  %v613_v25 = vld [vmem:[#allocation5 + $0x3e8] sm:$0xff]  ;;  %v571_v26 = vld [vmem:[#allocation5 + $0x298] sm:$0xff] }
  0x80   : > { %777 = vmatpush.msrb.mxu0 %v507_v36  ;;  %796 = vmatpush.msrb.mxu1 %v558_v37  ;;  %v664_v27 = vld [vmem:[#allocation5 + $0x580] sm:$0xff]  ;;  %v517_v28 = vld [vmem:[#allocation5 + $0xe8] sm:$0xff]  ;;  %v610_v29 = vld [vmem:[#allocation5 + $0x3d0] sm:$0xff] }
  0x81   : > { %818 = vmatpush.msrb.mxu2 %v600_v38  ;;  %837 = vmatpush.msrb.mxu3 %v651_v39  ;;  %v568_v30 = vld [vmem:[#allocation5 + $0x280] sm:$0xff]  ;;  %v661_v31 = vld [vmem:[#allocation5 + $0x568] sm:$0xff]  ;;  %v514_v32 = vld [vmem:[#allocation5 + $0xd0] sm:$0xff] }
  0x82   : > { %778 = vmatpush.msrb.mxu0 %v504_v40  ;;  %797 = vmatpush.msrb.mxu1 %v555_v41  ;;  %v607_v33 = vld [vmem:[#allocation5 + $0x3b8] sm:$0xff]  ;;  %v565_v34 = vld [vmem:[#allocation5 + $0x268] sm:$0xff]  ;;  %v658_v35 = vld [vmem:[#allocation5 + $0x550] sm:$0xff] }
  0x83   : > { %819 = vmatpush.msrb.mxu2 %v597_v42  ;;  %838 = vmatpush.msrb.mxu3 %v648_v43  ;;  %v511_v36 = vld [vmem:[#allocation5 + $0xb8] sm:$0xff]  ;;  %v604_v37 = vld [vmem:[#allocation5 + $0x3a0] sm:$0xff]  ;;  %v562_v38 = vld [vmem:[#allocation5 + $0x250] sm:$0xff] }
  0x84   : > { %744 = vmatmul.f32.vlgmr.msra.gmra.mxu2 %v2736_v44  ;;  %779 = vmatpush.msrb.mxu0 %v501_v45  ;;  %v655_v39 = vld [vmem:[#allocation5 + $0x538] sm:$0xff]  ;;  %v508_v40 = vld [vmem:[#allocation5 + $0xa0] sm:$0xff]  ;;  %v601_v41 = vld [vmem:[#allocation5 + $0x388] sm:$0xff] }
  0x85   : > { %798 = vmatpush.msrb.mxu1 %v552_v46  ;;  %820 = vmatpush.msrb.mxu2 %v594_v47  ;;  %v559_v42 = vld [vmem:[#allocation5 + $0x238] sm:$0xff]  ;;  %v652_v43 = vld [vmem:[#allocation5 + $0x520] sm:$0xff]  ;;  %v505_v45 = vld [vmem:[#allocation5 + $0x88] sm:$0xff] }
  0x86   : > { %839 = vmatpush.msrb.mxu3 %v645_v48  ;;  %704 = vmatmul.f32.vlgmr.msra.gmra.mxu0 %v2739_v49  ;;  %v598_v46 = vld [vmem:[#allocation5 + $0x370] sm:$0xff]  ;;  %v556_v47 = vld [vmem:[#allocation5 + $0x220] sm:$0xff]  ;;  %v649_v48 = vld [vmem:[#allocation5 + $0x508] sm:$0xff] }
  0x87   : > { %764 = vmatmul.f32.vlgmr.msra.gmra.mxu3 %v2743_v50  ;;  %780 = vmatpush.msrb.mxu0 %v498_v51  ;;  %v502_v51 = vld [vmem:[#allocation5 + $0x70] sm:$0xff] }
  0x88   : > { %799 = vmatpush.msrb.mxu1 %v549_v52  ;;  %821 = vmatpush.msrb.mxu2 %v591_v53  ;;  %v595_v52 = vld [vmem:[#allocation5 + $0x358] sm:$0xff]  ;;  %v553_v53 = vld [vmem:[#allocation5 + $0x208] sm:$0xff] }
  0x89   : > { %840 = vmatpush.msrb.mxu3 %v642_v54  ;;  %724 = vmatmul.f32.vlgmr.msra.gmra.mxu1 %v2747_v55  ;;  %v646_v54 = vld [vmem:[#allocation5 + $0x4f0] sm:$0xff] }
  0x8a   : > { %781 = vmatpush.msrb.mxu0 %v495_v56  ;;  %800 = vmatpush.msrb.mxu1 %v546_v57  ;;  %v499_v56 = vld [vmem:[#allocation5 + $0x58] sm:$0xff]  ;;  %v592_v57 = vld [vmem:[#allocation5 + $0x340] sm:$0xff] }
  0x8b   : > { %822 = vmatpush.msrb.mxu2 %v588_v58  ;;  %841 = vmatpush.msrb.mxu3 %v639_v59  ;;  %v550_v58 = vld [vmem:[#allocation5 + $0x1f0] sm:$0xff]  ;;  %v643_v59 = vld [vmem:[#allocation5 + $0x4d8] sm:$0xff] }
  0x8c   : > { %782 = vmatpush.msrb.mxu0 %v492_v60  ;;  %801 = vmatpush.msrb.mxu1 %v543_v61  ;;  %v496_v60 = vld [vmem:[#allocation5 + $0x40] sm:$0xff]  ;;  %v589_v61 = vld [vmem:[#allocation5 + $0x328] sm:$0xff] }
  0x8d   : > { %823 = vmatpush.msrb.mxu2 %v585_v62  ;;  %842 = vmatpush.msrb.mxu3 %v636_v63  ;;  %v547_v62 = vld [vmem:[#allocation5 + $0x1d8] sm:$0xff]  ;;  %v640_v63 = vld [vmem:[#allocation5 + $0x4c0] sm:$0xff] }
  0x8e   : > { %824 = vmatmul.f32.vlgmr.msrb.gmra.mxu2 %v2736_v44  ;;  %783 = vmatpush.msrb.mxu0 %v489_v0  ;;  %v493_v0 = vld [vmem:[#allocation5 + $0x28] sm:$0xff] }
  0x8f   : > { %888 = vmatpush.msra.mxu2 %v631_v1  ;;  %802 = vmatpush.msrb.mxu1 %v540_v2  ;;  %v586_v1 = vld [vmem:[#allocation5 + $0x310] sm:$0xff]  ;;  %v544_v2 = vld [vmem:[#allocation5 + $0x1c0] sm:$0xff] }
  0x90   : > { %843 = vmatpush.msrb.mxu3 %v633_v3  ;;  %784 = vmatmul.f32.vlgmr.msrb.gmra.mxu0 %v2739_v49  ;;  %v637_v3 = vld [vmem:[#allocation5 + $0x4a8] sm:$0xff] }
  0x91   : > { %844 = vmatmul.f32.vlgmr.msrb.gmra.mxu3 %v2743_v50  ;;  %848 = vmatpush.msra.mxu0 %v535_v4  ;;  %v490_v4 = vld [vmem:[#allocation5 + $0x10] sm:$0xff] }
  0x92   : > { %889 = vmatpush.msra.mxu2 %v628_v5  ;;  %908 = vmatpush.msra.mxu3 %v679_v6  ;;  %v541_v5 = vld [vmem:[#allocation5 + $0x1a8] sm:$0xff]  ;;  %v634_v6 = vld [vmem:[#allocation5 + $0x490] sm:$0xff] }
  0x93   : > { %803 = vmatpush.msrb.mxu1 %v537_v7  ;;  %849 = vmatpush.msra.mxu0 %v532_v8  ;;  %v538_v7 = vld [vmem:[#allocation5 + $0x190] sm:$0xff] }
  0x94   : > { %804 = vmatmul.f32.vlgmr.msrb.gmra.mxu1 %v2747_v55  ;;  %890 = vmatpush.msra.mxu2 %v625_v9  ;;  %v967_v8 = vld [vmem:[#allocation8 + $0xf0] sm:$0xff]  ;;  %v968_v9 = vld [vmem:[#allocation8 + $0xf8] sm:$0xff] }
  0x95   : > { %868 = vmatpush.msra.mxu1 %v583_v10  ;;  %909 = vmatpush.msra.mxu3 %v676_v11  ;;  %v965_v10 = vld [vmem:[#allocation8 + $0xe0] sm:$0xff]  ;;  %v999_v11 = vld [vmem:[#allocation8 + $0x1f0] sm:$0xff] }
  0x96   : > { %850 = vmatpush.msra.mxu0 %v529_v12  ;;  %891 = vmatpush.msra.mxu2 %v622_v13  ;;  %v966_v12 = vld [vmem:[#allocation8 + $0xe8] sm:$0xff]  ;;  %v963_v13 = vld [vmem:[#allocation8 + $0xd0] sm:$0xff] }
  0x97   : > { %869 = vmatpush.msra.mxu1 %v580_v14  ;;  %910 = vmatpush.msra.mxu3 %v673_v15  ;;  %v964_v14 = vld [vmem:[#allocation8 + $0xd8] sm:$0xff]  ;;  %v961_v15 = vld [vmem:[#allocation8 + $0xc0] sm:$0xff] }
  0x98   : > { %851 = vmatpush.msra.mxu0 %v526_v16  ;;  %892 = vmatpush.msra.mxu2 %v619_v17  ;;  %v995_v16 = vld [vmem:[#allocation8 + $0x1d0] sm:$0xff]  ;;  %v993_v17 = vld [vmem:[#allocation8 + $0x1c0] sm:$0xff] }
  0x99   : > { %870 = vmatpush.msra.mxu1 %v577_v18  ;;  %911 = vmatpush.msra.mxu3 %v670_v19  ;;  %v960_v18 = vld [vmem:[#allocation8 + $0xb8] sm:$0xff]  ;;  %v957_v19 = vld [vmem:[#allocation8 + $0xa0] sm:$0xff] }
  0x9a   : > { %852 = vmatpush.msra.mxu0 %v523_v20  ;;  %893 = vmatpush.msra.mxu2 %v616_v21  ;;  %v958_v20 = vld [vmem:[#allocation8 + $0xa8] sm:$0xff]  ;;  %v955_v21 = vld [vmem:[#allocation8 + $0x90] sm:$0xff] }
  0x9b   : > { %871 = vmatpush.msra.mxu1 %v574_v22  ;;  %912 = vmatpush.msra.mxu3 %v667_v23  ;;  %v989_v22 = vld [vmem:[#allocation8 + $0x1a0] sm:$0xff]  ;;  %v956_v23 = vld [vmem:[#allocation8 + $0x98] sm:$0xff] }
  0x9c   : > { %853 = vmatpush.msra.mxu0 %v520_v24  ;;  %894 = vmatpush.msra.mxu2 %v613_v25  ;;  %v953_v24 = vld [vmem:[#allocation8 + $0x80] sm:$0xff]  ;;  %v951_v25 = vld [vmem:[#allocation8 + $0x70] sm:$0xff] }
  0x9d   : > { %872 = vmatpush.msra.mxu1 %v571_v26  ;;  %913 = vmatpush.msra.mxu3 %v664_v27  ;;  %v949_v26 = vld [vmem:[#allocation8 + $0x60] sm:$0xff]  ;;  %v947_v27 = vld [vmem:[#allocation8 + $0x50] sm:$0xff] }
  0x9e   : > { %854 = vmatpush.msra.mxu0 %v517_v28  ;;  %895 = vmatpush.msra.mxu2 %v610_v29  ;;  %v945_v28 = vld [vmem:[#allocation8 + $0x40] sm:$0xff]  ;;  %v943_v29 = vld [vmem:[#allocation8 + $0x30] sm:$0xff] }
  0x9f   : > { %873 = vmatpush.msra.mxu1 %v568_v30  ;;  %914 = vmatpush.msra.mxu3 %v661_v31  ;;  %v941_v30 = vld [vmem:[#allocation8 + $0x20] sm:$0xff]  ;;  %v939_v31 = vld [vmem:[#allocation8 + $0x10] sm:$0xff] }
  0xa0   : > { %855 = vmatpush.msra.mxu0 %v514_v32  ;;  %896 = vmatpush.msra.mxu2 %v607_v33  ;;  %v937_v32 = vld [vmem:[#allocation8] sm:$0xff]  ;;  %v1000_v33 = vld [vmem:[#allocation8 + $0x1f8] sm:$0xff] }
  0xa1   : > { %874 = vmatpush.msra.mxu1 %v565_v34  ;;  %915 = vmatpush.msra.mxu3 %v658_v35  ;;  %v998_v34 = vld [vmem:[#allocation8 + $0x1e8] sm:$0xff]  ;;  %v996_v35 = vld [vmem:[#allocation8 + $0x1d8] sm:$0xff] }
  0xa2   : > { %856 = vmatpush.msra.mxu0 %v511_v36  ;;  %897 = vmatpush.msra.mxu2 %v604_v37  ;;  %v987_v36 = vld [vmem:[#allocation8 + $0x190] sm:$0xff]  ;;  %v954_v37 = vld [vmem:[#allocation8 + $0x88] sm:$0xff] }
  0xa3   : > { %875 = vmatpush.msra.mxu1 %v562_v38  ;;  %916 = vmatpush.msra.mxu3 %v655_v39  ;;  %v994_v38 = vld [vmem:[#allocation8 + $0x1c8] sm:$0xff]  ;;  %v985_v39 = vld [vmem:[#allocation8 + $0x180] sm:$0xff] }
  0xa4   : > { %857 = vmatpush.msra.mxu0 %v508_v40  ;;  %898 = vmatpush.msra.mxu2 %v601_v41  ;;  %v952_v40 = vld [vmem:[#allocation8 + $0x78] sm:$0xff] }
  0xa5   : > { %876 = vmatpush.msra.mxu1 %v559_v42  ;;  %917 = vmatpush.msra.mxu3 %v652_v43  ;;  %v992_v41 = vld [vmem:[#allocation8 + $0x1b8] sm:$0xff]  ;;  %v983_v42 = vld [vmem:[#allocation8 + $0x170] sm:$0xff]  ;;  %v950_v43 = vld [vmem:[#allocation8 + $0x68] sm:$0xff] }
  0xa6   : > { %858 = vmatpush.msra.mxu0 %v505_v45  ;;  %899 = vmatpush.msra.mxu2 %v598_v46  ;;  %v990_v45 = vld [vmem:[#allocation8 + $0x1a8] sm:$0xff]  ;;  %v981_v46 = vld [vmem:[#allocation8 + $0x160] sm:$0xff] }
  0xa7   : > { %877 = vmatpush.msra.mxu1 %v556_v47  ;;  %918 = vmatpush.msra.mxu3 %v649_v48  ;;  %v948_v47 = vld [vmem:[#allocation8 + $0x58] sm:$0xff] }
  0xa8   : > { %859 = vmatpush.msra.mxu0 %v502_v51  ;;  %900 = vmatpush.msra.mxu2 %v595_v52  ;;  %v988_v48 = vld [vmem:[#allocation8 + $0x198] sm:$0xff]  ;;  %v979_v51 = vld [vmem:[#allocation8 + $0x150] sm:$0xff]  ;;  %v946_v52 = vld [vmem:[#allocation8 + $0x48] sm:$0xff] }
  0xa9   : > { %878 = vmatpush.msra.mxu1 %v553_v53  ;;  %919 = vmatpush.msra.mxu3 %v646_v54  ;;  %v986_v53 = vld [vmem:[#allocation8 + $0x188] sm:$0xff]  ;;  %v977_v54 = vld [vmem:[#allocation8 + $0x140] sm:$0xff] }
  0xaa   : > { %860 = vmatpush.msra.mxu0 %v499_v56  ;;  %901 = vmatpush.msra.mxu2 %v592_v57  ;;  %v944_v56 = vld [vmem:[#allocation8 + $0x38] sm:$0xff] }
  0xab   : > { %879 = vmatpush.msra.mxu1 %v550_v58  ;;  %920 = vmatpush.msra.mxu3 %v643_v59  ;;  %v984_v57 = vld [vmem:[#allocation8 + $0x178] sm:$0xff]  ;;  %v975_v58 = vld [vmem:[#allocation8 + $0x130] sm:$0xff]  ;;  %v942_v59 = vld [vmem:[#allocation8 + $0x28] sm:$0xff] }
  0xac   : > { %861 = vmatpush.msra.mxu0 %v496_v60  ;;  %902 = vmatpush.msra.mxu2 %v589_v61  ;;  %v982_v60 = vld [vmem:[#allocation8 + $0x168] sm:$0xff]  ;;  %v973_v61 = vld [vmem:[#allocation8 + $0x120] sm:$0xff] }
  0xad   : > { %880 = vmatpush.msra.mxu1 %v547_v62  ;;  %921 = vmatpush.msra.mxu3 %v640_v63  ;;  %v940_v62 = vld [vmem:[#allocation8 + $0x18] sm:$0xff] }
  0xae   : > { %862 = vmatpush.msra.mxu0 %v493_v0  ;;  %903 = vmatpush.msra.mxu2 %v586_v1  ;;  %v980_v63 = vld [vmem:[#allocation8 + $0x158] sm:$0xff]  ;;  %v971_v0 = vld [vmem:[#allocation8 + $0x110] sm:$0xff]  ;;  %v938_v1 = vld [vmem:[#allocation8 + $0x8] sm:$0xff] }
  0xaf   : > { %881 = vmatpush.msra.mxu1 %v544_v2  ;;  %922 = vmatpush.msra.mxu3 %v637_v3  ;;  %v978_v2 = vld [vmem:[#allocation8 + $0x148] sm:$0xff]  ;;  %v969_v3 = vld [vmem:[#allocation8 + $0x100] sm:$0xff] }
  0xb0   : > { %904 = vmatmul.f32.vlgmr.msra.gmra.mxu2 %v2736_v44  ;;  %863 = vmatpush.msra.mxu0 %v490_v4  ;;  %v997_v44 = vld [vmem:[#allocation8 + $0x1e0] sm:$0xff]  ;;  %v976_v4 = vld [vmem:[#allocation8 + $0x138] sm:$0xff] }
  0xb1   : > { %882 = vmatpush.msra.mxu1 %v541_v5  ;;  %923 = vmatpush.msra.mxu3 %v634_v6  ;;  %v1031_v5 = vld [vmem:[#allocation8 + $0x2f0] sm:$0xff]  ;;  %v1032_v6 = vld [vmem:[#allocation8 + $0x2f8] sm:$0xff] }
  0xb2   : > { %864 = vmatmul.f32.vlgmr.msra.gmra.mxu0 %v2739_v49  ;;  %924 = vmatmul.f32.vlgmr.msra.gmra.mxu3 %v2743_v50  ;;  %v962_v49 = vld [vmem:[#allocation8 + $0xc8] sm:$0xff]  ;;  %v959_v50 = vld [vmem:[#allocation8 + $0xb0] sm:$0xff] }
  0xb3   : > { %883 = vmatpush.msra.mxu1 %v538_v7  ;;  %1039 = vmatpush.msrb.mxu0 %v967_v8  ;;  %v974_v7 = vld [vmem:[#allocation8 + $0x128] sm:$0xff]  ;;  %v1029_v8 = vld [vmem:[#allocation8 + $0x2e0] sm:$0xff] }
  0xb4   : > { %884 = vmatmul.f32.vlgmr.msra.gmra.mxu1 %v2747_v55  ;;  %1099 = vmatpush.msrb.mxu3 %v968_v9  ;;  %v991_v55 = vld [vmem:[#allocation8 + $0x1b0] sm:$0xff]  ;;  %v1030_v9 = vld [vmem:[#allocation8 + $0x2e8] sm:$0xff] }
  0xb5   : > { %1040 = vmatpush.msrb.mxu0 %v965_v10  ;;  %1059 = vmatpush.msrb.mxu1 %v999_v11  ;;  %v2759_v10 = vld [vmem:[#allocation7] sm:$0x7] }
  0xb6   : > { %1100 = vmatpush.msrb.mxu3 %v966_v12  ;;  %1079 = vmatpush.msrb.mxu2 %v1031_v5  ;;  %v972_v11 = vld [vmem:[#allocation8 + $0x118] sm:$0xff]  ;;  %v1027_v12 = vld [vmem:[#allocation8 + $0x2d0] sm:$0xff]  ;;  %v1251_v5 = vld [vmem:[#allocation11 + $0x2a0] sm:$0xff] }
  0xb7   : > { %1041 = vmatpush.msrb.mxu0 %v963_v13  ;;  %1060 = vmatpush.msrb.mxu1 %v997_v44  ;;  %v1028_v13 = vld [vmem:[#allocation8 + $0x2d8] sm:$0xff]  ;;  %v970_v44 = vld [vmem:[#allocation8 + $0x108] sm:$0xff] }
  0xb8   : > { %1101 = vmatpush.msrb.mxu3 %v964_v14  ;;  %1080 = vmatpush.msrb.mxu2 %v1029_v8  ;;  %v1025_v14 = vld [vmem:[#allocation8 + $0x2c0] sm:$0xff]  ;;  %v1200_v8 = vld [vmem:[#allocation11 + $0x108] sm:$0xff] }
  0xb9   : > { %1042 = vmatpush.msrb.mxu0 %v961_v15  ;;  %1061 = vmatpush.msrb.mxu1 %v995_v16  ;;  %v682_v15 = vperm.slane %v2759_v10, 0  ;;  %v1026_v16 = vld [vmem:[#allocation8 + $0x2c8] sm:$0xff] }
  0xba   : > { %1102 = vmatpush.msrb.mxu3 %v962_v49  ;;  %1081 = vmatpush.msrb.mxu2 %v1027_v12  ;;  %v1023_v49 = vld [vmem:[#allocation8 + $0x2b0] sm:$0xff]  ;;  %v1239_v12 = vld [vmem:[#allocation11 + $0x240] sm:$0xff] }
  0xbb   : > { %1043 = vmatpush.msrb.mxu0 %v959_v50  ;;  %1062 = vmatpush.msrb.mxu1 %v993_v17  ;;  %v1024_v50 = vld [vmem:[#allocation8 + $0x2b8] sm:$0xff] }
  0xbc   : > { %1103 = vmatpush.msrb.mxu3 %v960_v18  ;;  %1082 = vmatpush.msrb.mxu2 %v1025_v14  ;;  %v1021_v18 = vld [vmem:[#allocation8 + $0x2a0] sm:$0xff] }
  0xbd   : > { %1044 = vmatpush.msrb.mxu0 %v957_v19  ;;  %1063 = vmatpush.msrb.mxu1 %v991_v55  ;;  %v1022_v55 = vld [vmem:[#allocation8 + $0x2a8] sm:$0xff] }
  0xbe   : > { %1104 = vmatpush.msrb.mxu3 %v958_v20  ;;  %1083 = vmatpush.msrb.mxu2 %v1023_v49  ;;  %v1019_v20 = vld [vmem:[#allocation8 + $0x290] sm:$0xff] }
  0xbf   : > { %1045 = vmatpush.msrb.mxu0 %v955_v21  ;;  %1064 = vmatpush.msrb.mxu1 %v989_v22  ;;  %v1020_v22 = vld [vmem:[#allocation8 + $0x298] sm:$0xff] }
  0xc0   : > { %1105 = vmatpush.msrb.mxu3 %v956_v23  ;;  %1084 = vmatpush.msrb.mxu2 %v1021_v18 }
  0xc1   : > { %1046 = vmatpush.msrb.mxu0 %v953_v24  ;;  %1065 = vmatpush.msrb.mxu1 %v987_v36 }
  0xc2   : > { %1106 = vmatpush.msrb.mxu3 %v954_v37  ;;  %1085 = vmatpush.msrb.mxu2 %v1019_v20  ;;  %v1197_v20 = vld [vmem:[#allocation11 + $0xf0] sm:$0xff] }
  0xc3   : > { %1047 = vmatpush.msrb.mxu0 %v951_v25  ;;  %1066 = vmatpush.msrb.mxu1 %v985_v39  ;;  %v1017_v25 = vld [vmem:[#allocation8 + $0x280] sm:$0xff]  ;;  %v1011_v39 = vld [vmem:[#allocation8 + $0x250] sm:$0xff] }
  0xc4   : > { %1107 = vmatpush.msrb.mxu3 %v952_v40  ;;  %1086 = vmatpush.msrb.mxu2 %v1017_v25  ;;  %v1012_v40 = vld [vmem:[#allocation8 + $0x258] sm:$0xff]  ;;  %v1188_v25 = vld [vmem:[#allocation11 + $0xa8] sm:$0xff] }
  0xc5   : > { %1048 = vmatpush.msrb.mxu0 %v949_v26  ;;  %1067 = vmatpush.msrb.mxu1 %v983_v42  ;;  %v1018_v26 = vld [vmem:[#allocation8 + $0x288] sm:$0xff] }
  0xc6   : > { %1108 = vmatpush.msrb.mxu3 %v950_v43  ;;  %v1009_v43 = vld [vmem:[#allocation8 + $0x240] sm:$0xff] }
  0xc7   : > { %1049 = vmatpush.msrb.mxu0 %v947_v27  ;;  %1068 = vmatpush.msrb.mxu1 %v981_v46 }
  0xc8   : > { %1109 = vmatpush.msrb.mxu3 %v948_v47  ;;  %v1007_v47 = vld [vmem:[#allocation8 + $0x230] sm:$0xff] }
  0xc9   : > { %1050 = vmatpush.msrb.mxu0 %v945_v28  ;;  %1069 = vmatpush.msrb.mxu1 %v979_v51  ;;  %v1015_v28 = vld [vmem:[#allocation8 + $0x270] sm:$0xff] }
  0xca   : > { %1110 = vmatpush.msrb.mxu3 %v946_v52  ;;  %1087 = vmatpush.msrb.mxu2 %v1015_v28  ;;  %v1258_v28 = vld [vmem:[#allocation11 + $0x2d8] sm:$0xff] }
  0xcb   : > { %1051 = vmatpush.msrb.mxu0 %v943_v29  ;;  %1070 = vmatpush.msrb.mxu1 %v977_v54  ;;  %v1006_v54 = vld [vmem:[#allocation8 + $0x228] sm:$0xff] }
  0xcc   : > { %1111 = vmatpush.msrb.mxu3 %v944_v56 }
  0xcd   : > { %1052 = vmatpush.msrb.mxu0 %v941_v30  ;;  %1071 = vmatpush.msrb.mxu1 %v975_v58  ;;  %v683_v30 = vperm.slane %v2759_v10, 1  ;;  %v1004_v58 = vld [vmem:[#allocation8 + $0x218] sm:$0xff] }
  0xce   : > { %1112 = vmatpush.msrb.mxu3 %v942_v59 }
  0xcf   : > { %1053 = vmatpush.msrb.mxu0 %v939_v31  ;;  %1072 = vmatpush.msrb.mxu1 %v973_v61  ;;  %v1016_v31 = vld [vmem:[#allocation8 + $0x278] sm:$0xff]  ;;  %v1002_v61 = vld [vmem:[#allocation8 + $0x208] sm:$0xff] }
  0xd0   : > { %1113 = vmatpush.msrb.mxu3 %v940_v62 }
  0xd1   : > { %1054 = vmatpush.msrb.mxu0 %v937_v32  ;;  %1073 = vmatpush.msrb.mxu1 %v971_v0  ;;  %v1257_v0 = vld [vmem:[#allocation11 + $0x2d0] sm:$0xff] }
  0xd2   : > { %1114 = vmatpush.msrb.mxu3 %v938_v1  ;;  %v1212_v1 = vld [vmem:[#allocation11 + $0x168] sm:$0xff] }
  0xd3   : > { %1119 = vmatpush.msra.mxu0 %v1000_v33  ;;  %1074 = vmatpush.msrb.mxu1 %v969_v3  ;;  %v1013_v33 = vld [vmem:[#allocation8 + $0x260] sm:$0xff] }
  0xd4   : > { %1088 = vmatpush.msrb.mxu2 %v1013_v33  ;;  %v1254_v3 = vld [vmem:[#allocation11 + $0x2b8] sm:$0xff] }
  0xd5   : > { %1120 = vmatpush.msra.mxu0 %v998_v34  ;;  %1139 = vmatpush.msra.mxu1 %v1032_v6  ;;  %v1014_v34 = vld [vmem:[#allocation8 + $0x268] sm:$0xff]  ;;  %v1182_v33 = vld [vmem:[#allocation11 + $0x78] sm:$0xff] }
  0xd6   : > { %1089 = vmatpush.msrb.mxu2 %v1011_v39  ;;  %v1203_v6 = vld [vmem:[#allocation11 + $0x120] sm:$0xff]  ;;  %v1218_v39 = vld [vmem:[#allocation11 + $0x198] sm:$0xff] }
  0xd7   : > { %1121 = vmatpush.msra.mxu0 %v996_v35  ;;  %1140 = vmatpush.msra.mxu1 %v1030_v9  ;;  %v1245_v9 = vld [vmem:[#allocation11 + $0x270] sm:$0xff] }
  0xd8   : > { %1090 = vmatpush.msrb.mxu2 %v1009_v43  ;;  %v1215_v43 = vld [vmem:[#allocation11 + $0x180] sm:$0xff] }
  0xd9   : > { %1122 = vmatpush.msra.mxu0 %v994_v38  ;;  %1141 = vmatpush.msra.mxu1 %v1028_v13  ;;  %v684_v13 = vperm.slane %v2759_v10, 2  ;;  %v1191_v10 = vld [vmem:[#allocation11 + $0xc0] sm:$0xff] }
  0xda   : > { %1091 = vmatpush.msrb.mxu2 %v1007_v47  ;;  %v1173_v47 = vld [vmem:[#allocation11 + $0x30] sm:$0xff] }
  0xdb   : > { %1123 = vmatpush.msra.mxu0 %v992_v41  ;;  %1142 = vmatpush.msra.mxu1 %v1026_v16 }
  0xdd   : > { %1124 = vmatpush.msra.mxu0 %v990_v45  ;;  %1143 = vmatpush.msra.mxu1 %v1024_v50  ;;  %v1010_v45 = vld [vmem:[#allocation8 + $0x248] sm:$0xff] }
  0xdf   : > { %1125 = vmatpush.msra.mxu0 %v988_v48  ;;  %1144 = vmatpush.msra.mxu1 %v1022_v55  ;;  %v1008_v48 = vld [vmem:[#allocation8 + $0x238] sm:$0xff] }
  0xe1   : > { %1126 = vmatpush.msra.mxu0 %v986_v53  ;;  %1145 = vmatpush.msra.mxu1 %v1020_v22  ;;  %v1005_v53 = vld [vmem:[#allocation8 + $0x220] sm:$0xff] }
  0xe2   : > { %1092 = vmatpush.msrb.mxu2 %v1005_v53  ;;  %v1194_v22 = vld [vmem:[#allocation11 + $0xd8] sm:$0xff] }
  0xe3   : > { %1127 = vmatpush.msra.mxu0 %v984_v57  ;;  %1146 = vmatpush.msra.mxu1 %v1018_v26  ;;  %v1003_v57 = vld [vmem:[#allocation8 + $0x210] sm:$0xff]  ;;  %v1227_v26 = vld [vmem:[#allocation11 + $0x1e0] sm:$0xff]  ;;  %v1170_v53 = vld [vmem:[#allocation11 + $0x18] sm:$0xff] }
  0xe4   : > { %1093 = vmatpush.msrb.mxu2 %v1003_v57  ;;  %v1240_v57 = vld [vmem:[#allocation11 + $0x248] sm:$0xff] }
  0xe5   : > { %1128 = vmatpush.msra.mxu0 %v982_v60  ;;  %1147 = vmatpush.msra.mxu1 %v1016_v31  ;;  %v1001_v60 = vld [vmem:[#allocation8 + $0x200] sm:$0xff] }
  0xe6   : > { %1094 = vmatpush.msrb.mxu2 %v1001_v60  ;;  %v1255_v31 = vld [vmem:[#allocation11 + $0x2c0] sm:$0xff]  ;;  %v1214_v60 = vld [vmem:[#allocation11 + $0x178] sm:$0xff] }
  0xe7   : > { %1129 = vmatpush.msra.mxu0 %v980_v63  ;;  %1148 = vmatpush.msra.mxu1 %v1014_v34  ;;  %v1260_v63 = vld [vmem:[#allocation11 + $0x2e8] sm:$0xff]  ;;  %v1221_v34 = vld [vmem:[#allocation11 + $0x1b0] sm:$0xff] }
  0xe8   : > { %1291 = vmatpush.msra.mxu3 %v1260_v63  ;;  %1271 = vmatpush.msra.mxu2 %v1212_v1  ;;  %v1192_v63 = vld [vmem:[#allocation11 + $0xc8] sm:$0xff]  ;;  %v1250_v1 = vld [vmem:[#allocation11 + $0x298] sm:$0xff] }
  0xe9   : > { %1130 = vmatpush.msra.mxu0 %v978_v2  ;;  %1149 = vmatpush.msra.mxu1 %v1012_v40  ;;  %v1209_v2 = vld [vmem:[#allocation11 + $0x150] sm:$0xff] }
  0xea   : > { %1292 = vmatpush.msra.mxu3 %v1257_v0  ;;  %1272 = vmatpush.msra.mxu2 %v1209_v2  ;;  %v1249_v40 = vld [vmem:[#allocation11 + $0x290] sm:$0xff]  ;;  %v1211_v0 = vld [vmem:[#allocation11 + $0x160] sm:$0xff]  ;;  %v1234_v2 = vld [vmem:[#allocation11 + $0x218] sm:$0xff] }
  0xeb   : > { %1131 = vmatpush.msra.mxu0 %v976_v4  ;;  %1150 = vmatpush.msra.mxu1 %v1010_v45  ;;  %v1206_v4 = vld [vmem:[#allocation11 + $0x138] sm:$0xff] }
  0xec   : > { %1293 = vmatpush.msra.mxu3 %v1254_v3  ;;  %1273 = vmatpush.msra.mxu2 %v1206_v4  ;;  %v1262_v45 = vld [vmem:[#allocation11 + $0x2f8] sm:$0xff]  ;;  %v1189_v3 = vld [vmem:[#allocation11 + $0xb0] sm:$0xff]  ;;  %v1208_v4 = vld [vmem:[#allocation11 + $0x148] sm:$0xff] }
  0xed   : > { %1132 = vmatpush.msra.mxu0 %v974_v7  ;;  %1151 = vmatpush.msra.mxu1 %v1008_v48  ;;  %v1248_v7 = vld [vmem:[#allocation11 + $0x288] sm:$0xff]  ;;  %v1201_v48 = vld [vmem:[#allocation11 + $0x110] sm:$0xff] }
  0xee   : > { %1294 = vmatpush.msra.mxu3 %v1251_v5  ;;  %1274 = vmatpush.msra.mxu2 %v1203_v6  ;;  %v1247_v5 = vld [vmem:[#allocation11 + $0x280] sm:$0xff] }
  0xef   : > { %1133 = vmatpush.msra.mxu0 %v972_v11  ;;  %1152 = vmatpush.msra.mxu1 %v1006_v54  ;;  %v1242_v11 = vld [vmem:[#allocation11 + $0x258] sm:$0xff]  ;;  %v1231_v6 = vld [vmem:[#allocation11 + $0x200] sm:$0xff] }
  0xf0   : > { %1295 = vmatpush.msra.mxu3 %v1248_v7  ;;  %1275 = vmatpush.msra.mxu2 %v1200_v8  ;;  %v1198_v54 = vld [vmem:[#allocation11 + $0xf8] sm:$0xff]  ;;  %v1205_v8 = vld [vmem:[#allocation11 + $0x130] sm:$0xff] }
  0xf1   : > { %1134 = vmatpush.msra.mxu0 %v970_v44  ;;  %1153 = vmatpush.msra.mxu1 %v1004_v58  ;;  %v1167_v58 = vld [vmem:[#allocation11] sm:$0xff]  ;;  %v1186_v7 = vld [vmem:[#allocation11 + $0x98] sm:$0xff] }
  0xf2   : > { %1296 = vmatpush.msra.mxu3 %v1245_v9  ;;  %1276 = vmatpush.msra.mxu2 %v1197_v20  ;;  %v1244_v9 = vld [vmem:[#allocation11 + $0x268] sm:$0xff] }
  0xf3   : > { %1154 = vmatpush.msra.mxu1 %v1002_v61  ;;  %v1253_v61 = vld [vmem:[#allocation11 + $0x2b0] sm:$0xff]  ;;  %v1232_v20 = vld [vmem:[#allocation11 + $0x208] sm:$0xff] }
  0xf4   : > { %1297 = vmatpush.msra.mxu3 %v1242_v11  ;;  %1277 = vmatpush.msra.mxu2 %v1194_v22  ;;  %v1228_v11 = vld [vmem:[#allocation11 + $0x1e8] sm:$0xff] }
  0xf5   : > { %v1216_v22 = vld [vmem:[#allocation11 + $0x188] sm:$0xff] }
  0xf6   : > { %1298 = vmatpush.msra.mxu3 %v1239_v12  ;;  %1278 = vmatpush.msra.mxu2 %v1191_v10  ;;  %v1202_v12 = vld [vmem:[#allocation11 + $0x118] sm:$0xff]  ;;  %v1229_v10 = vld [vmem:[#allocation11 + $0x1f0] sm:$0xff] }
  0xf8   : > { %1279 = vmatpush.msra.mxu2 %v1188_v25  ;;  %v1187_v25 = vld [vmem:[#allocation11 + $0xa0] sm:$0xff] }
 0x103   : > { %v705_v17 = vpop.f32.mrf.mxu0 }
 0x104   : > { %v706_v19 = vadd.f32 %v705_v17, %v682_v15 }
 0x106   : > { %v725_v21 = vpop.f32.mrf.mxu1 }
 0x107   : > { %v726_v23 = vadd.f32 %v725_v21, %v706_v19  ;;  %v745_v24 = vpop.f32.mrf.mxu2  ;;  %v1236_v21 = vld [vmem:[#allocation11 + $0x228] sm:$0xff] }
 0x108   : > { %1299 = vmatpush.msra.mxu3 %v1236_v21  ;;  %v1177_v21 = vld [vmem:[#allocation11 + $0x50] sm:$0xff] }
 0x109   : > { %v746_v27 = vadd.f32 %v745_v24, %v726_v23  ;;  %v1233_v23 = vld [vmem:[#allocation11 + $0x210] sm:$0xff]  ;;  %v1230_v24 = vld [vmem:[#allocation11 + $0x1f8] sm:$0xff] }
 0x10a   : > { %v765_v29 = vpop.f32.mrf.mxu3  ;;  %1300 = vmatpush.msra.mxu3 %v1233_v23  ;;  %v1190_v23 = vld [vmem:[#allocation11 + $0xb8] sm:$0xff] }
 0x10b   : > { %v766_v32 = vadd.f32 %v765_v29, %v746_v27  ;;  %v1261_v27 = vld [vmem:[#allocation11 + $0x2f0] sm:$0xff] }
 0x10c   : > { %1301 = vmatpush.msra.mxu3 %v1230_v24  ;;  %v1185_v29 = vld [vmem:[#allocation11 + $0x90] sm:$0xff]  ;;  %v1174_v24 = vld [vmem:[#allocation11 + $0x38] sm:$0xff] }
 0x10d   : > { %vm928_vm0 = vcmp.ge.f32.partialorder %v766_v32, 0.0  ;;  %v931_v35 = vmul.f32 0.2, %v766_v32  ;;  %v785_v36 = vpop.f32.mrf.mxu0  ;;  %1280 = vmatpush.msra.mxu2 %v1185_v29  ;;  %v1223_v29 = vld [vmem:[#allocation11 + $0x1c0] sm:$0xff] }
 0x10e   : > { %v786_v37 = vadd.f32 %v785_v36, %v683_v30  ;;  %v1224_v30 = vld [vmem:[#allocation11 + $0x1c8] sm:$0xff]  ;;  %1302 = vmatpush.msra.mxu3 %v1227_v26  ;;  %v1226_v26 = vld [vmem:[#allocation11 + $0x1d8] sm:$0xff] }
 0x10f   : > { %v934_v38 = vsel %vm928_vm0, %v766_v32, %v931_v35  ;;  %v1213_v32 = vld [vmem:[#allocation11 + $0x170] sm:$0xff]  ;;  %v1210_v35 = vld [vmem:[#allocation11 + $0x158] sm:$0xff]  ;;  %v1252_v36 = vld [vmem:[#allocation11 + $0x2a8] sm:$0xff]  ;;  %1281 = vmatpush.msra.mxu2 %v1182_v33 }
 0x110   : > { %1055 = vmatmul.f32.vlgmr.msrb.gmra.mxu0 %v934_v38  ;;  %1115 = vmatmul.f32.vlgmr.msrb.gmra.mxu3 %v934_v38  ;;  %v1179_v38 = vld [vmem:[#allocation11 + $0x60] sm:$0xff]  ;;  %v1178_v33 = vld [vmem:[#allocation11 + $0x58] sm:$0xff] }
 0x111   : > { %v805_v41 = vpop.f32.mrf.mxu1  ;;  %v825_v42 = vpop.f32.mrf.mxu2  ;;  %1311 = vmatpush.msrb.mxu0 %v1213_v32  ;;  %1303 = vmatpush.msra.mxu3 %v1224_v30  ;;  %v1168_v30 = vld [vmem:[#allocation11 + $0x8] sm:$0xff] }
 0x112   : > { %v806_v46 = vadd.f32 %v805_v41, %v786_v37  ;;  %v1207_v37 = vld [vmem:[#allocation11 + $0x140] sm:$0xff]  ;;  %v1204_v41 = vld [vmem:[#allocation11 + $0x128] sm:$0xff]  ;;  %1282 = vmatpush.msra.mxu2 %v1179_v38 }
 0x113   : > { %1312 = vmatpush.msrb.mxu0 %v1210_v35  ;;  %1304 = vmatpush.msra.mxu3 %v1221_v34  ;;  %v1220_v32 = vld [vmem:[#allocation11 + $0x1a8] sm:$0xff]  ;;  %v1217_v34 = vld [vmem:[#allocation11 + $0x190] sm:$0xff]  ;;  %v1175_v35 = vld [vmem:[#allocation11 + $0x40] sm:$0xff] }
 0x114   : > { %v826_v51 = vadd.f32 %v825_v42, %v806_v46  ;;  %v845_v52 = vpop.f32.mrf.mxu3  ;;  %v1176_v42 = vld [vmem:[#allocation11 + $0x48] sm:$0xff]  ;;  %v1246_v46 = vld [vmem:[#allocation11 + $0x278] sm:$0xff] }
 0x115   : > { %1313 = vmatpush.msrb.mxu0 %v1207_v37  ;;  %1305 = vmatpush.msra.mxu3 %v1218_v39  ;;  %v1169_v37 = vld [vmem:[#allocation11 + $0x10] sm:$0xff]  ;;  %v1524_v39 = vld [vmem:[#allocation13 + $0x3e0] sm:$0xff] }
 0x116   : > { %v846_v56 = vadd.f32 %v845_v52, %v826_v51  ;;  %1283 = vmatpush.msra.mxu2 %v1176_v42  ;;  %v1259_v51 = vld [vmem:[#allocation11 + $0x2e0] sm:$0xff]  ;;  %v1033_v42 = vld [vmem:[#allocation10] sm:$0x3] }
 0x117   : > { %1314 = vmatpush.msrb.mxu0 %v1204_v41  ;;  %1306 = vmatpush.msra.mxu3 %v1215_v43  ;;  %v1243_v52 = vld [vmem:[#allocation11 + $0x260] sm:$0xff] }
 0x118   : > { %vm929_vm1 = vcmp.ge.f32.partialorder %v846_v56, 0.0  ;;  %v932_v59 = vmul.f32 0.2, %v846_v56  ;;  %1284 = vmatpush.msra.mxu2 %v1173_v47  ;;  %v1460_v41 = vld [vmem:[#allocation13 + $0x1e0] sm:$0xff] }
 0x119   : > { %1371 = vmatpush.msrb.mxu3 %v1262_v45  ;;  %1315 = vmatpush.msrb.mxu0 %v1201_v48  ;;  %v1516_v43 = vld [vmem:[#allocation13 + $0x3a0] sm:$0xff] }
 0x11a   : > { %v935_v62 = vsel %vm929_vm1, %v846_v56, %v932_v59  ;;  %v1256_v56 = vld [vmem:[#allocation11 + $0x2c8] sm:$0xff]  ;;  %v1195_v59 = vld [vmem:[#allocation11 + $0xe0] sm:$0xff]  ;;  %1285 = vmatpush.msra.mxu2 %v1170_v53 }
 0x11b   : > { %1075 = vmatmul.f32.vlgmr.msrb.gmra.mxu1 %v935_v62  ;;  %1135 = vmatmul.f32.vlgmr.msra.gmra.mxu0 %v935_v62  ;;  %v1237_v62 = vld [vmem:[#allocation11 + $0x230] sm:$0xff]  ;;  %v1456_v45 = vld [vmem:[#allocation13 + $0x1c0] sm:$0xff] }
 0x11c   : > { %1331 = vmatpush.msrb.mxu1 %v1261_v27  ;;  %1372 = vmatpush.msrb.mxu3 %v1259_v51  ;;  %v1171_v27 = vld [vmem:[#allocation11 + $0x20] sm:$0xff] }
 0x11d   : > { %1316 = vmatpush.msrb.mxu0 %v1198_v54  ;;  %1286 = vmatpush.msra.mxu2 %v1167_v58  ;;  %v1452_v47 = vld [vmem:[#allocation13 + $0x1a0] sm:$0xff] }
 0x11e   : > { %1332 = vmatpush.msrb.mxu1 %v1258_v28  ;;  %1373 = vmatpush.msrb.mxu3 %v1256_v56  ;;  %v1184_v28 = vld [vmem:[#allocation11 + $0x88] sm:$0xff]  ;;  %v1448_v53 = vld [vmem:[#allocation13 + $0x180] sm:$0xff] }
 0x11f   : > { %1317 = vmatpush.msrb.mxu0 %v1195_v59  ;;  %v1508_v54 = vld [vmem:[#allocation13 + $0x360] sm:$0xff] }
 0x120   : > { %1333 = vmatpush.msrb.mxu1 %v1255_v31  ;;  %1374 = vmatpush.msrb.mxu3 %v1253_v61  ;;  %v1181_v31 = vld [vmem:[#allocation11 + $0x70] sm:$0xff]  ;;  %v1504_v59 = vld [vmem:[#allocation13 + $0x340] sm:$0xff] }
 0x121   : > { %1318 = vmatpush.msrb.mxu0 %v1192_v63  ;;  %v1440_v61 = vld [vmem:[#allocation13 + $0x140] sm:$0xff] }
 0x122   : > { %1334 = vmatpush.msrb.mxu1 %v1252_v36  ;;  %1375 = vmatpush.msrb.mxu3 %v1250_v1  ;;  %v1172_v36 = vld [vmem:[#allocation11 + $0x28] sm:$0xff] }
 0x123   : > { %1319 = vmatpush.msrb.mxu0 %v1189_v3 }
 0x124   : > { %1335 = vmatpush.msrb.mxu1 %v1249_v40  ;;  %1376 = vmatpush.msrb.mxu3 %v1247_v5  ;;  %v1520_v40 = vld [vmem:[#allocation13 + $0x3c0] sm:$0xff] }
 0x125   : > { %1320 = vmatpush.msrb.mxu0 %v1186_v7  ;;  %v1432_v5 = vld [vmem:[#allocation13 + $0x100] sm:$0xff] }
 0x126   : > { %1336 = vmatpush.msrb.mxu1 %v1246_v46  ;;  %1377 = vmatpush.msrb.mxu3 %v1244_v9  ;;  %v1036_v46 = vperm.slane %v1033_v42, 1  ;;  %v1488_v9 = vld [vmem:[#allocation13 + $0x2c0] sm:$0xff] }
 0x128   : > { %1337 = vmatpush.msrb.mxu1 %v1243_v52  ;;  %v1512_v52 = vld [vmem:[#allocation13 + $0x380] sm:$0xff] }
 0x12a   : > { %1338 = vmatpush.msrb.mxu1 %v1240_v57  ;;  %v1444_v57 = vld [vmem:[#allocation13 + $0x160] sm:$0xff] }
 0x12c   : > { %1339 = vmatpush.msrb.mxu1 %v1237_v62  ;;  %v1500_v62 = vld [vmem:[#allocation13 + $0x320] sm:$0xff] }
 0x12e   : > { %1340 = vmatpush.msrb.mxu1 %v1234_v2  ;;  %v1496_v2 = vld [vmem:[#allocation13 + $0x300] sm:$0xff] }
 0x12f   : > { %v865_v44 = vpop.f32.mrf.mxu0 }
 0x130   : > { %v866_v14 = vadd.f32 %v865_v44, %v684_v13  ;;  %1341 = vmatpush.msrb.mxu1 %v1231_v6  ;;  %v1241_v13 = vld [vmem:[#allocation11 + $0x250] sm:$0xff]  ;;  %v1492_v6 = vld [vmem:[#allocation13 + $0x2e0] sm:$0xff] }
 0x131   : > { %v885_v15 = vpop.f32.mrf.mxu1  ;;  %v1225_v44 = vld [vmem:[#allocation11 + $0x1d0] sm:$0xff]  ;;  %1378 = vmatpush.msrb.mxu3 %v1241_v13  ;;  %v1428_v13 = vld [vmem:[#allocation13 + $0xe0] sm:$0xff] }
 0x132   : > { %v886_v16 = vadd.f32 %v885_v15, %v866_v14  ;;  %1342 = vmatpush.msrb.mxu1 %v1228_v11  ;;  %v1199_v14 = vld [vmem:[#allocation11 + $0x100] sm:$0xff]  ;;  %v1238_v15 = vld [vmem:[#allocation11 + $0x238] sm:$0xff] }
 0x133   : > { %v905_v49 = vpop.f32.mrf.mxu2  ;;  %1379 = vmatpush.msrb.mxu3 %v1238_v15  ;;  %v1484_v15 = vld [vmem:[#allocation13 + $0x2a0] sm:$0xff] }
 0x134   : > { %v906_v50 = vadd.f32 %v905_v49, %v886_v16  ;;  %1343 = vmatpush.msrb.mxu1 %v1225_v44  ;;  %v1183_v16 = vld [vmem:[#allocation11 + $0x80] sm:$0xff]  ;;  %v1222_v49 = vld [vmem:[#allocation11 + $0x1b8] sm:$0xff] }
 0x135   : > { %v925_v17 = vpop.f32.mrf.mxu3  ;;  %1321 = vmatpush.msrb.mxu0 %v1183_v16 }
 0x136   : > { %v926_v18 = vadd.f32 %v925_v17, %v906_v50  ;;  %v1196_v50 = vld [vmem:[#allocation11 + $0xe8] sm:$0xff]  ;;  %1344 = vmatpush.msrb.mxu1 %v1222_v49  ;;  %v1235_v17 = vld [vmem:[#allocation11 + $0x220] sm:$0xff] }
 0x137   : > { %1380 = vmatpush.msrb.mxu3 %v1235_v17  ;;  %v1424_v49 = vld [vmem:[#allocation13 + $0xc0] sm:$0xff] }
 0x138   : > { %vm930_vm2 = vcmp.ge.f32.partialorder %v926_v18, 0.0  ;;  %v933_v19 = vmul.f32 0.2, %v926_v18  ;;  %v1480_v17 = vld [vmem:[#allocation13 + $0x280] sm:$0xff] }
 0x139   : > { %1381 = vmatpush.msrb.mxu3 %v1232_v20 }
 0x13a   : > { %v936_v55 = vsel %vm930_vm2, %v926_v18, %v933_v19  ;;  %v1180_v18 = vld [vmem:[#allocation11 + $0x68] sm:$0xff]  ;;  %v1219_v19 = vld [vmem:[#allocation11 + $0x1a0] sm:$0xff] }
 0x13b   : > { %1095 = vmatmul.f32.vlgmr.msrb.gmra.mxu2 %v936_v55  ;;  %1155 = vmatmul.f32.vlgmr.msra.gmra.mxu1 %v936_v55  ;;  %v1193_v55 = vld [vmem:[#allocation11 + $0xd0] sm:$0xff] }
 0x13c   : > { %1351 = vmatpush.msrb.mxu2 %v1214_v60  ;;  %1322 = vmatpush.msrb.mxu0 %v1180_v18  ;;  %v1035_v60 = vperm.slane %v1033_v42, 0  ;;  %v1585_v42 = vld [vmem:[#allocation13 + $0x5c8] sm:$0xff] }
 0x13d   : > { %1345 = vmatpush.msrb.mxu1 %v1219_v19  ;;  %1382 = vmatpush.msrb.mxu3 %v1229_v10  ;;  %v1449_v19 = vld [vmem:[#allocation13 + $0x188] sm:$0xff]  ;;  %v1420_v10 = vld [vmem:[#allocation13 + $0xa0] sm:$0xff] }
 0x13e   : > { %1352 = vmatpush.msrb.mxu2 %v1211_v0  ;;  %1323 = vmatpush.msrb.mxu0 %v1177_v21  ;;  %v1436_v0 = vld [vmem:[#allocation13 + $0x120] sm:$0xff] }
 0x13f   : > { %1346 = vmatpush.msrb.mxu1 %v1216_v22  ;;  %1383 = vmatpush.msrb.mxu3 %v1226_v26  ;;  %v1476_v21 = vld [vmem:[#allocation13 + $0x260] sm:$0xff]  ;;  %v1445_v22 = vld [vmem:[#allocation13 + $0x168] sm:$0xff] }
 0x140   : > { %1353 = vmatpush.msrb.mxu2 %v1208_v4  ;;  %1324 = vmatpush.msrb.mxu0 %v1174_v24  ;;  %v1472_v24 = vld [vmem:[#allocation13 + $0x240] sm:$0xff] }
 0x141   : > { %1384 = vmatpush.msrb.mxu3 %v1223_v29  ;;  %1622 = vmatpush.msra.mxu1 %v1524_v39  ;;  %v1580_v26 = vld [vmem:[#allocation13 + $0x5a0] sm:$0xff]  ;;  %v1437_v29 = vld [vmem:[#allocation13 + $0x128] sm:$0xff] }
 0x142   : > { %1354 = vmatpush.msrb.mxu2 %v1205_v8  ;;  %1325 = vmatpush.msrb.mxu0 %v1171_v27  ;;  %v1461_v8 = vld [vmem:[#allocation13 + $0x1e8] sm:$0xff]  ;;  %v1416_v27 = vld [vmem:[#allocation13 + $0x80] sm:$0xff] }
 0x143   : > { %1385 = vmatpush.msrb.mxu3 %v1220_v32  ;;  %1623 = vmatpush.msra.mxu1 %v1520_v40  ;;  %v1433_v32 = vld [vmem:[#allocation13 + $0x108] sm:$0xff]  ;;  %v1404_v39 = vld [vmem:[#allocation13 + $0x20] sm:$0xff] }
 0x144   : > { %1355 = vmatpush.msrb.mxu2 %v1202_v12  ;;  %1326 = vmatpush.msrb.mxu0 %v1168_v30  ;;  %v1576_v30 = vld [vmem:[#allocation13 + $0x580] sm:$0xff]  ;;  %v1425_v40 = vld [vmem:[#allocation13 + $0xc8] sm:$0xff] }
 0x145   : > { %1386 = vmatpush.msrb.mxu3 %v1217_v34  ;;  %1624 = vmatpush.msra.mxu1 %v1516_v43  ;;  %v1464_v34 = vld [vmem:[#allocation13 + $0x200] sm:$0xff] }
 0x146   : > { %1356 = vmatpush.msrb.mxu2 %v1199_v14  ;;  %1602 = vmatpush.msra.mxu0 %v1460_v41  ;;  %v1457_v14 = vld [vmem:[#allocation13 + $0x1c8] sm:$0xff]  ;;  %v1564_v41 = vld [vmem:[#allocation13 + $0x520] sm:$0xff] }
 0x147   : > { %1625 = vmatpush.msra.mxu1 %v1512_v52  ;;  %v1400_v43 = vld [vmem:[#allocation13] sm:$0xff] }
 0x148   : > { %1357 = vmatpush.msrb.mxu2 %v1196_v50  ;;  %1603 = vmatpush.msra.mxu0 %v1456_v45  ;;  %v1453_v50 = vld [vmem:[#allocation13 + $0x1a8] sm:$0xff]  ;;  %v1556_v52 = vld [vmem:[#allocation13 + $0x4e0] sm:$0xff] }
 0x149   : > { %1626 = vmatpush.msra.mxu1 %v1508_v54  ;;  %v1421_v45 = vld [vmem:[#allocation13 + $0xa8] sm:$0xff] }
 0x14a   : > { %1358 = vmatpush.msrb.mxu2 %v1193_v55  ;;  %1604 = vmatpush.msra.mxu0 %v1452_v47  ;;  %v1588_v55 = vld [vmem:[#allocation13 + $0x5e0] sm:$0xff]  ;;  %v1581_v47 = vld [vmem:[#allocation13 + $0x5a8] sm:$0xff] }
 0x14b   : > { %1627 = vmatpush.msra.mxu1 %v1504_v59  ;;  %v1521_v54 = vld [vmem:[#allocation13 + $0x3c8] sm:$0xff] }
 0x14c   : > { %1359 = vmatpush.msrb.mxu2 %v1190_v23  ;;  %1605 = vmatpush.msra.mxu0 %v1448_v53  ;;  %v1584_v23 = vld [vmem:[#allocation13 + $0x5c0] sm:$0xff]  ;;  %v1577_v53 = vld [vmem:[#allocation13 + $0x588] sm:$0xff] }
 0x14d   : > { %1628 = vmatpush.msra.mxu1 %v1500_v62  ;;  %v1517_v59 = vld [vmem:[#allocation13 + $0x3a8] sm:$0xff] }
 0x14e   : > { %1360 = vmatpush.msrb.mxu2 %v1187_v25  ;;  %1606 = vmatpush.msra.mxu0 %v1444_v57  ;;  %v1441_v25 = vld [vmem:[#allocation13 + $0x148] sm:$0xff]  ;;  %v1552_v57 = vld [vmem:[#allocation13 + $0x4c0] sm:$0xff] }
 0x14f   : > { %1629 = vmatpush.msra.mxu1 %v1496_v2  ;;  %v1569_v62 = vld [vmem:[#allocation13 + $0x548] sm:$0xff] }
 0x150   : > { %1361 = vmatpush.msrb.mxu2 %v1184_v28  ;;  %1607 = vmatpush.msra.mxu0 %v1440_v61  ;;  %v1468_v28 = vld [vmem:[#allocation13 + $0x220] sm:$0xff]  ;;  %v1565_v2 = vld [vmem:[#allocation13 + $0x528] sm:$0xff] }
 0x151   : > { %1630 = vmatpush.msra.mxu1 %v1492_v6  ;;  %v1548_v61 = vld [vmem:[#allocation13 + $0x4a0] sm:$0xff]  ;;  %v1526_v6 = vld [vmem:[#allocation13 + $0x3f0] sm:$0xff] }
 0x152   : > { %1362 = vmatpush.msrb.mxu2 %v1181_v31  ;;  %1608 = vmatpush.msra.mxu0 %v1436_v0  ;;  %v1412_v31 = vld [vmem:[#allocation13 + $0x60] sm:$0xff]  ;;  %v1405_v0 = vld [vmem:[#allocation13 + $0x28] sm:$0xff] }
 0x153   : > { %1631 = vmatpush.msra.mxu1 %v1488_v9  ;;  %v1505_v9 = vld [vmem:[#allocation13 + $0x348] sm:$0xff] }
 0x154   : > { %1363 = vmatpush.msrb.mxu2 %v1178_v33  ;;  %1609 = vmatpush.msra.mxu0 %v1432_v5  ;;  %v1572_v33 = vld [vmem:[#allocation13 + $0x560] sm:$0xff] }
 0x155   : > { %1632 = vmatpush.msra.mxu1 %v1484_v15  ;;  %v1540_v5 = vld [vmem:[#allocation13 + $0x460] sm:$0xff]  ;;  %v1514_v15 = vld [vmem:[#allocation13 + $0x390] sm:$0xff] }
 0x156   : > { %1364 = vmatpush.msrb.mxu2 %v1175_v35  ;;  %1610 = vmatpush.msra.mxu0 %v1428_v13  ;;  %v1408_v35 = vld [vmem:[#allocation13 + $0x40] sm:$0xff] }
 0x157   : > { %1633 = vmatpush.msra.mxu1 %v1480_v17  ;;  %v1532_v13 = vld [vmem:[#allocation13 + $0x420] sm:$0xff]  ;;  %v1506_v17 = vld [vmem:[#allocation13 + $0x350] sm:$0xff] }
 0x158   : > { %1365 = vmatpush.msrb.mxu2 %v1172_v36  ;;  %1611 = vmatpush.msra.mxu0 %v1424_v49  ;;  %v1429_v36 = vld [vmem:[#allocation13 + $0xe8] sm:$0xff]  ;;  %v1510_v49 = vld [vmem:[#allocation13 + $0x370] sm:$0xff] }
 0x159   : > { %1634 = vmatpush.msra.mxu1 %v1476_v21  ;;  %v1497_v21 = vld [vmem:[#allocation13 + $0x308] sm:$0xff] }
 0x15a   : > { %1366 = vmatpush.msrb.mxu2 %v1169_v37  ;;  %1612 = vmatpush.msra.mxu0 %v1420_v10  ;;  %v1568_v37 = vld [vmem:[#allocation13 + $0x540] sm:$0xff]  ;;  %v1498_v10 = vld [vmem:[#allocation13 + $0x310] sm:$0xff] }
 0x15b   : > { %1635 = vmatpush.msra.mxu1 %v1472_v24  ;;  %v1493_v24 = vld [vmem:[#allocation13 + $0x2e8] sm:$0xff] }
 0x15c   : > { %1613 = vmatpush.msra.mxu0 %v1416_v27  ;;  %v1494_v27 = vld [vmem:[#allocation13 + $0x2f0] sm:$0xff] }
 0x15d   : > { %1636 = vmatpush.msra.mxu1 %v1468_v28  ;;  %v1489_v28 = vld [vmem:[#allocation13 + $0x2c8] sm:$0xff] }
 0x15e   : > { %1614 = vmatpush.msra.mxu0 %v1412_v31  ;;  %v1490_v31 = vld [vmem:[#allocation13 + $0x2d0] sm:$0xff] }
 0x15f   : > { %1637 = vmatpush.msra.mxu1 %v1464_v34  ;;  %v1438_v34 = vld [vmem:[#allocation13 + $0x130] sm:$0xff] }
 0x160   : > { %1615 = vmatpush.msra.mxu0 %v1408_v35  ;;  %v1486_v35 = vld [vmem:[#allocation13 + $0x2b0] sm:$0xff] }
 0x162   : > { %1616 = vmatpush.msra.mxu0 %v1404_v39  ;;  %v1482_v39 = vld [vmem:[#allocation13 + $0x290] sm:$0xff] }
 0x164   : > { %1617 = vmatpush.msra.mxu0 %v1400_v43  ;;  %v1478_v43 = vld [vmem:[#allocation13 + $0x270] sm:$0xff] }
 0x18d   : > { %v1056_v38 = vpop.f32.mrf.mxu0 }
 0x18e   : > { %v1057_v3 = vadd.f32 %v1056_v38, %v1035_v60  ;;  %v1589_v38 = vld [vmem:[#allocation13 + $0x5e8] sm:$0xff] }
 0x18f   : > { %v1409_v60 = vld [vmem:[#allocation13 + $0x48] sm:$0xff] }
 0x193   : > { %v1116_v51 = vpop.f32.mrf.mxu3 }
 0x194   : > { %v1117_v56 = vadd.f32 %v1116_v51, %v1036_v46  ;;  %v1560_v46 = vld [vmem:[#allocation13 + $0x500] sm:$0xff]  ;;  %v1417_v51 = vld [vmem:[#allocation13 + $0x88] sm:$0xff] }
 0x198   : > { %v1076_v48 = vpop.f32.mrf.mxu1  ;;  %v1136_v58 = vpop.f32.mrf.mxu0 }
 0x199   : > { %v1137_v63 = vadd.f32 %v1136_v58, %v1117_v56  ;;  %v1077_v11 = vadd.f32 %v1076_v48, %v1057_v3  ;;  %v1525_v48 = vld [vmem:[#allocation13 + $0x3e8] sm:$0xff] }
 0x19a   : > { %v1413_v56 = vld [vmem:[#allocation13 + $0x68] sm:$0xff] }
 0x19b   : > { %v1573_v58 = vld [vmem:[#allocation13 + $0x568] sm:$0xff] }
 0x19c   : > { %v1509_v3 = vld [vmem:[#allocation13 + $0x368] sm:$0xff] }
 0x1b8   : > { %v1156_v1 = vpop.f32.mrf.mxu1 }
 0x1b9   : > { %v1157_v4 = vadd.f32 %v1156_v1, %v1137_v63  ;;  %v1513_v63 = vld [vmem:[#allocation13 + $0x388] sm:$0xff]  ;;  %v1544_v1 = vld [vmem:[#allocation13 + $0x480] sm:$0xff] }
 0x1bb   : > { %vm1160_vm3 = vcmp.ge.f32.partialorder %v1157_v4, 0.0  ;;  %v1162_v7 = vmul.f32 0.2, %v1157_v4 }
 0x1bd   : > { %v1164_v12 = vsel %vm1160_vm3, %v1157_v4, %v1162_v7  ;;  %v1401_v4 = vld [vmem:[#allocation13 + $0x8] sm:$0xff] }
 0x1be   : > { %v1096_v44 = vpop.f32.mrf.mxu2  ;;  %1166 = vst [vmem:[%s2765_s27 + $0x8] sm:$0xff] %v1164_v12  ;;  %1307 = vmatmul.f32.vlgmr.msra.gmra.mxu3 %v1164_v12  ;;  %1347 = vmatmul.f32.vlgmr.msrb.gmra.mxu1 %v1164_v12  ;;  %v1561_v7 = vld [vmem:[#allocation13 + $0x508] sm:$0xff] }
 0x1bf   : > { %v1097_v16 = vadd.f32 %v1096_v44, %v1077_v11  ;;  %1662 = vmatpush.msra.mxu3 %v1461_v8  ;;  %1702 = vmatpush.msrb.mxu1 %v1589_v38  ;;  %v1536_v8 = vld [vmem:[#allocation13 + $0x440] sm:$0xff]  ;;  %v1522_v11 = vld [vmem:[#allocation13 + $0x3d0] sm:$0xff] }
 0x1c0   : > { %v1518_v44 = vld [vmem:[#allocation13 + $0x3b0] sm:$0xff] }
 0x1c1   : > { %vm1159_vm4 = vcmp.ge.f32.partialorder %v1097_v16, 0.0  ;;  %v1161_v18 = vmul.f32 0.2, %v1097_v16  ;;  %1663 = vmatpush.msra.mxu3 %v1457_v14  ;;  %1703 = vmatpush.msrb.mxu1 %v1585_v42  ;;  %v1528_v14 = vld [vmem:[#allocation13 + $0x400] sm:$0xff]  ;;  %v1434_v38 = vld [vmem:[#allocation13 + $0x110] sm:$0xff] }
 0x1c2   : > { %v1430_v42 = vld [vmem:[#allocation13 + $0xf0] sm:$0xff] }
 0x1c3   : > { %v1163_v20 = vsel %vm1159_vm4, %v1097_v16, %v1161_v18  ;;  %1664 = vmatpush.msra.mxu3 %v1453_v50  ;;  %1704 = vmatpush.msrb.mxu1 %v1581_v47  ;;  %v1462_v16 = vld [vmem:[#allocation13 + $0x1f0] sm:$0xff]  ;;  %v1501_v18 = vld [vmem:[#allocation13 + $0x328] sm:$0xff] }
 0x1c4   : > { %1165 = vst [vmem:[%s2765_s27] sm:$0xff] %v1163_v20  ;;  %1287 = vmatmul.f32.vlgmr.msra.gmra.mxu2 %v1163_v20  ;;  %1327 = vmatmul.f32.vlgmr.msrb.gmra.mxu0 %v1163_v20  ;;  %v1458_v50 = vld [vmem:[#allocation13 + $0x1d0] sm:$0xff] }
 0x1c5   : > { %1665 = vmatpush.msra.mxu3 %v1449_v19  ;;  %1642 = vmatpush.msra.mxu2 %v1588_v55  ;;  %v1553_v19 = vld [vmem:[#allocation13 + $0x4c8] sm:$0xff]  ;;  %v1454_v55 = vld [vmem:[#allocation13 + $0x1b0] sm:$0xff] }
 0x1c6   : > { %1387 = vmatmul.f32.vlgmr.msrb.gmra.mxu3 %v1164_v12  ;;  %1682 = vmatpush.msrb.mxu0 %v1525_v48  ;;  %v1557_v12 = vld [vmem:[#allocation13 + $0x4e8] sm:$0xff]  ;;  %v1474_v47 = vld [vmem:[#allocation13 + $0x250] sm:$0xff] }
 0x1c7   : > { %1666 = vmatpush.msra.mxu3 %v1445_v22  ;;  %1643 = vmatpush.msra.mxu2 %v1584_v23  ;;  %v1549_v22 = vld [vmem:[#allocation13 + $0x4a8] sm:$0xff]  ;;  %v1450_v23 = vld [vmem:[#allocation13 + $0x190] sm:$0xff] }
 0x1c8   : > { %1705 = vmatpush.msrb.mxu1 %v1577_v53  ;;  %1683 = vmatpush.msrb.mxu0 %v1521_v54  ;;  %v1469_v48 = vld [vmem:[#allocation13 + $0x228] sm:$0xff]  ;;  %v1418_v54 = vld [vmem:[#allocation13 + $0x90] sm:$0xff] }
 0x1c9   : > { %1667 = vmatpush.msra.mxu3 %v1441_v25  ;;  %1644 = vmatpush.msra.mxu2 %v1580_v26  ;;  %v1545_v25 = vld [vmem:[#allocation13 + $0x488] sm:$0xff]  ;;  %v1446_v26 = vld [vmem:[#allocation13 + $0x170] sm:$0xff] }
 0x1ca   : > { %1706 = vmatpush.msrb.mxu1 %v1573_v58  ;;  %1684 = vmatpush.msrb.mxu0 %v1517_v59  ;;  %v1465_v53 = vld [vmem:[#allocation13 + $0x208] sm:$0xff]  ;;  %v1410_v58 = vld [vmem:[#allocation13 + $0x50] sm:$0xff] }
 0x1cb   : > { %1668 = vmatpush.msra.mxu3 %v1437_v29  ;;  %1645 = vmatpush.msra.mxu2 %v1576_v30  ;;  %v1541_v29 = vld [vmem:[#allocation13 + $0x468] sm:$0xff]  ;;  %v1442_v30 = vld [vmem:[#allocation13 + $0x150] sm:$0xff] }
 0x1cc   : > { %1367 = vmatmul.f32.vlgmr.msrb.gmra.mxu2 %v1163_v20  ;;  %1707 = vmatpush.msrb.mxu1 %v1569_v62  ;;  %v1502_v20 = vld [vmem:[#allocation13 + $0x330] sm:$0xff] }
 0x1cd   : > { %1669 = vmatpush.msra.mxu3 %v1433_v32  ;;  %1646 = vmatpush.msra.mxu2 %v1572_v33  ;;  %v1485_v32 = vld [vmem:[#allocation13 + $0x2a8] sm:$0xff]  ;;  %v1406_v59 = vld [vmem:[#allocation13 + $0x30] sm:$0xff] }
 0x1ce   : > { %1685 = vmatpush.msrb.mxu0 %v1513_v63  ;;  %1708 = vmatpush.msrb.mxu1 %v1565_v2  ;;  %v1537_v33 = vld [vmem:[#allocation13 + $0x448] sm:$0xff] }
 0x1cf   : > { %1670 = vmatpush.msra.mxu3 %v1429_v36  ;;  %1647 = vmatpush.msra.mxu2 %v1568_v37  ;;  %v1481_v36 = vld [vmem:[#allocation13 + $0x288] sm:$0xff] }
 0x1d0   : > { %1686 = vmatpush.msrb.mxu0 %v1509_v3  ;;  %1709 = vmatpush.msrb.mxu1 %v1561_v7  ;;  %v1533_v37 = vld [vmem:[#allocation13 + $0x428] sm:$0xff]  ;;  %v1463_v7 = vld [vmem:[#allocation13 + $0x1f8] sm:$0xff] }
 0x1d1   : > { %1671 = vmatpush.msra.mxu3 %v1425_v40  ;;  %1648 = vmatpush.msra.mxu2 %v1564_v41  ;;  %v1477_v40 = vld [vmem:[#allocation13 + $0x268] sm:$0xff] }
 0x1d2   : > { %1687 = vmatpush.msrb.mxu0 %v1505_v9  ;;  %1710 = vmatpush.msrb.mxu1 %v1557_v12  ;;  %v1529_v41 = vld [vmem:[#allocation13 + $0x408] sm:$0xff] }
 0x1d3   : > { %1672 = vmatpush.msra.mxu3 %v1421_v45  ;;  %1649 = vmatpush.msra.mxu2 %v1560_v46  ;;  %v1473_v45 = vld [vmem:[#allocation13 + $0x248] sm:$0xff]  ;;  %v1426_v46 = vld [vmem:[#allocation13 + $0xd0] sm:$0xff] }
 0x1d4   : > { %1688 = vmatpush.msrb.mxu0 %v1501_v18  ;;  %1711 = vmatpush.msrb.mxu1 %v1553_v19  ;;  %v1586_v18 = vld [vmem:[#allocation13 + $0x5d0] sm:$0xff]  ;;  %v1447_v19 = vld [vmem:[#allocation13 + $0x178] sm:$0xff] }
 0x1d5   : > { %1673 = vmatpush.msra.mxu3 %v1417_v51  ;;  %1650 = vmatpush.msra.mxu2 %v1556_v52  ;;  %v1422_v51 = vld [vmem:[#allocation13 + $0xb0] sm:$0xff] }
 0x1d6   : > { %1689 = vmatpush.msrb.mxu0 %v1497_v21  ;;  %1712 = vmatpush.msrb.mxu1 %v1549_v22  ;;  %v1470_v52 = vld [vmem:[#allocation13 + $0x230] sm:$0xff] }
 0x1d7   : > { %1674 = vmatpush.msra.mxu3 %v1413_v56  ;;  %1651 = vmatpush.msra.mxu2 %v1552_v57  ;;  %v1466_v56 = vld [vmem:[#allocation13 + $0x210] sm:$0xff] }
 0x1d8   : > { %1690 = vmatpush.msrb.mxu0 %v1493_v24  ;;  %1713 = vmatpush.msrb.mxu1 %v1545_v25  ;;  %v1414_v57 = vld [vmem:[#allocation13 + $0x70] sm:$0xff]  ;;  %v1583_v24 = vld [vmem:[#allocation13 + $0x5b8] sm:$0xff] }
 0x1d9   : > { %1675 = vmatpush.msra.mxu3 %v1409_v60  ;;  %1652 = vmatpush.msra.mxu2 %v1548_v61  ;;  %v1402_v60 = vld [vmem:[#allocation13 + $0x10] sm:$0xff]  ;;  %v1263_v61 = vld [vmem:[%s2850_s6] sm:$0x7] }
 0x1da   : > { %1691 = vmatpush.msrb.mxu0 %v1489_v28  ;;  %1714 = vmatpush.msrb.mxu1 %v1541_v29  ;;  %v1266_v62 = vperm.slane %v1263_v61, 1  ;;  %v1265_v3 = vperm.slane %v1263_v61, 0  ;;  %v1582_v22 = vld [vmem:[#allocation13 + $0x5b0] sm:$0xff]  ;;  %v1579_v28 = vld [vmem:[#allocation13 + $0x598] sm:$0xff] }
 0x1db   : > { %1676 = vmatpush.msra.mxu3 %v1405_v0  ;;  %1653 = vmatpush.msra.mxu2 %v1544_v1  ;;  %v1578_v25 = vld [vmem:[#allocation13 + $0x590] sm:$0xff] }
 0x1dc   : > { %1692 = vmatpush.msrb.mxu0 %v1485_v32  ;;  %1715 = vmatpush.msrb.mxu1 %v1537_v33  ;;  %v1527_v32 = vld [vmem:[#allocation13 + $0x3f8] sm:$0xff] }
 0x1dd   : > { %1677 = vmatpush.msra.mxu3 %v1401_v4  ;;  %1654 = vmatpush.msra.mxu2 %v1540_v5  ;;  %v1575_v33 = vld [vmem:[#allocation13 + $0x578] sm:$0xff] }
 0x1de   : > { %1693 = vmatpush.msrb.mxu0 %v1481_v36  ;;  %1716 = vmatpush.msrb.mxu1 %v1533_v37  ;;  %v1523_v36 = vld [vmem:[#allocation13 + $0x3d8] sm:$0xff] }
 0x1df   : > { %1742 = vmatpush.msrb.mxu3 %v1526_v6  ;;  %1655 = vmatpush.msra.mxu2 %v1536_v8  ;;  %v1571_v37 = vld [vmem:[#allocation13 + $0x558] sm:$0xff] }
 0x1e0   : > { %1694 = vmatpush.msrb.mxu0 %v1477_v40  ;;  %1717 = vmatpush.msrb.mxu1 %v1529_v41  ;;  %v1519_v40 = vld [vmem:[#allocation13 + $0x3b8] sm:$0xff] }
 0x1e1   : > { %1743 = vmatpush.msrb.mxu3 %v1522_v11  ;;  %1656 = vmatpush.msra.mxu2 %v1532_v13  ;;  %v1459_v11 = vld [vmem:[#allocation13 + $0x1d8] sm:$0xff] }
 0x1e2   : > { %1695 = vmatpush.msrb.mxu0 %v1473_v45  ;;  %v1455_v13 = vld [vmem:[#allocation13 + $0x1b8] sm:$0xff] }
 0x1e3   : > { %1744 = vmatpush.msrb.mxu3 %v1518_v44  ;;  %1657 = vmatpush.msra.mxu2 %v1528_v14  ;;  %v1267_v14 = vperm.slane %v1263_v61, 2  ;;  %v1567_v41 = vld [vmem:[#allocation13 + $0x538] sm:$0xff] }
 0x1e4   : > { %1696 = vmatpush.msrb.mxu0 %v1469_v48  ;;  %v1515_v45 = vld [vmem:[#allocation13 + $0x398] sm:$0xff] }
 0x1e5   : > { %1745 = vmatpush.msrb.mxu3 %v1514_v15  ;;  %1722 = vmatpush.msrb.mxu2 %v1462_v16  ;;  %v1590_v15 = vld [vmem:[#allocation13 + $0x5f0] sm:$0xff]  ;;  %v1451_v16 = vld [vmem:[#allocation13 + $0x198] sm:$0xff] }
 0x1e6   : > { %1697 = vmatpush.msrb.mxu0 %v1465_v53  ;;  %v1419_v48 = vld [vmem:[#allocation13 + $0x98] sm:$0xff]  ;;  %v1554_v53 = vld [vmem:[#allocation13 + $0x4d0] sm:$0xff] }
 0x1e7   : > { %1746 = vmatpush.msrb.mxu3 %v1510_v49  ;;  %1723 = vmatpush.msrb.mxu2 %v1458_v50  ;;  %v1591_v50 = vld [vmem:[#allocation13 + $0x5f8] sm:$0xff] }
 0x1e8   : > { %v1551_v61 = vld [vmem:[#allocation13 + $0x4b8] sm:$0xff] }
 0x1e9   : > { %1747 = vmatpush.msrb.mxu3 %v1506_v17  ;;  %1724 = vmatpush.msrb.mxu2 %v1454_v55 }
 0x1eb   : > { %1748 = vmatpush.msrb.mxu3 %v1502_v20  ;;  %1725 = vmatpush.msrb.mxu2 %v1450_v23  ;;  %v1587_v20 = vld [vmem:[#allocation13 + $0x5d8] sm:$0xff] }
 0x1ec   : > { %v1443_v23 = vld [vmem:[#allocation13 + $0x158] sm:$0xff] }
 0x1ed   : > { %1749 = vmatpush.msrb.mxu3 %v1498_v10  ;;  %1726 = vmatpush.msrb.mxu2 %v1446_v26  ;;  %v1439_v26 = vld [vmem:[#allocation13 + $0x138] sm:$0xff] }
 0x1ef   : > { %1750 = vmatpush.msrb.mxu3 %v1494_v27  ;;  %1727 = vmatpush.msrb.mxu2 %v1442_v30  ;;  %v1574_v30 = vld [vmem:[#allocation13 + $0x570] sm:$0xff] }
 0x1f1   : > { %1751 = vmatpush.msrb.mxu3 %v1490_v31  ;;  %1728 = vmatpush.msrb.mxu2 %v1438_v34  ;;  %v1435_v31 = vld [vmem:[#allocation13 + $0x118] sm:$0xff]  ;;  %v1570_v34 = vld [vmem:[#allocation13 + $0x550] sm:$0xff] }
 0x1f3   : > { %1752 = vmatpush.msrb.mxu3 %v1486_v35  ;;  %1729 = vmatpush.msrb.mxu2 %v1434_v38  ;;  %v1431_v35 = vld [vmem:[#allocation13 + $0xf8] sm:$0xff]  ;;  %v1566_v38 = vld [vmem:[#allocation13 + $0x530] sm:$0xff] }
 0x1f5   : > { %1753 = vmatpush.msrb.mxu3 %v1482_v39  ;;  %1730 = vmatpush.msrb.mxu2 %v1430_v42  ;;  %v1427_v39 = vld [vmem:[#allocation13 + $0xd8] sm:$0xff]  ;;  %v1562_v42 = vld [vmem:[#allocation13 + $0x510] sm:$0xff] }
 0x1f7   : > { %1754 = vmatpush.msrb.mxu3 %v1478_v43  ;;  %1731 = vmatpush.msrb.mxu2 %v1426_v46  ;;  %v1423_v43 = vld [vmem:[#allocation13 + $0xb8] sm:$0xff] }
 0x1f8   : > { %v1563_v46 = vld [vmem:[#allocation13 + $0x518] sm:$0xff] }
 0x1f9   : > { %1755 = vmatpush.msrb.mxu3 %v1474_v47  ;;  %1732 = vmatpush.msrb.mxu2 %v1422_v51  ;;  %v1558_v47 = vld [vmem:[#allocation13 + $0x4f0] sm:$0xff]  ;;  %v1511_v51 = vld [vmem:[#allocation13 + $0x378] sm:$0xff] }
 0x1fb   : > { %1756 = vmatpush.msrb.mxu3 %v1470_v52  ;;  %1733 = vmatpush.msrb.mxu2 %v1418_v54  ;;  %v1559_v52 = vld [vmem:[#allocation13 + $0x4f8] sm:$0xff] }
 0x1fc   : > { %v1415_v54 = vld [vmem:[#allocation13 + $0x78] sm:$0xff] }
 0x1fd   : > { %1757 = vmatpush.msrb.mxu3 %v1466_v56  ;;  %1734 = vmatpush.msrb.mxu2 %v1414_v57  ;;  %v1507_v56 = vld [vmem:[#allocation13 + $0x358] sm:$0xff] }
 0x1fe   : > { %v1555_v57 = vld [vmem:[#allocation13 + $0x4d8] sm:$0xff] }
 0x1ff   : > { %1735 = vmatpush.msrb.mxu2 %v1410_v58  ;;  %v1550_v58 = vld [vmem:[#allocation13 + $0x4b0] sm:$0xff] }
 0x201   : > { %1736 = vmatpush.msrb.mxu2 %v1406_v59  ;;  %v1411_v59 = vld [vmem:[#allocation13 + $0x58] sm:$0xff] }
 0x203   : > { %1737 = vmatpush.msrb.mxu2 %v1402_v60  ;;  %v1503_v60 = vld [vmem:[#allocation13 + $0x338] sm:$0xff] }
 0x23b   : > { %v1348_v1 = vpop.f32.mrf.mxu1 }
 0x241   : > { %v1328_v63 = vpop.f32.mrf.mxu0  ;;  %v1308_v5 = vpop.f32.mrf.mxu3 }
 0x242   : > { %v1329_v0 = vadd.f32 %v1328_v63, %v1266_v62  ;;  %v1546_v62 = vld [vmem:[#allocation13 + $0x490] sm:$0xff]  ;;  %v1407_v63 = vld [vmem:[#allocation13 + $0x38] sm:$0xff] }
 0x244   : > { %v1349_v2 = vadd.f32 %v1348_v1, %v1329_v0  ;;  %v1499_v0 = vld [vmem:[#allocation13 + $0x318] sm:$0xff] }
 0x245   : > { %v1547_v1 = vld [vmem:[#allocation13 + $0x498] sm:$0xff] }
 0x246   : > { %v1395_v4 = vmul.f32 0.2, %v1349_v2  ;;  %vm1392_vm5 = vcmp.ge.f32.partialorder %v1349_v2, 0.0 }
 0x247   : > { %v1288_v6 = vpop.f32.mrf.mxu2 }
 0x248   : > { %v1289_v8 = vadd.f32 %v1288_v6, %v1265_v3  ;;  %v2772_v9 = vsel %vm1392_vm5, %v1349_v2, %v1395_v4  ;;  %v1542_v2 = vld [vmem:[#allocation13 + $0x470] sm:$0xff]  ;;  %v1403_v3 = vld [vmem:[#allocation13 + $0x18] sm:$0xff] }
 0x249   : > { %1638 = vmatmul.f32.vlgmr.msra.gmra.mxu1 %v2772_v9  ;;  %v1388_v21 = vpop.f32.mrf.mxu3  ;;  %v1495_v4 = vld [vmem:[#allocation13 + $0x2f8] sm:$0xff]  ;;  %v1538_v6 = vld [vmem:[#allocation13 + $0x450] sm:$0xff] }
 0x24a   : > { %v1309_v12 = vadd.f32 %v1308_v5, %v1289_v8  ;;  %1782 = vmatpush.msra.mxu1 %v1463_v7  ;;  %v1543_v5 = vld [vmem:[#allocation13 + $0x478] sm:$0xff] }
 0x24b   : > { %v1491_v7 = vld [vmem:[#allocation13 + $0x2d8] sm:$0xff] }
 0x24c   : > { %v1394_v44 = vmul.f32 0.2, %v1309_v12  ;;  %1783 = vmatpush.msra.mxu1 %v1459_v11  ;;  %vm1391_vm6 = vcmp.ge.f32.partialorder %v1309_v12, 0.0  ;;  %v1539_v8 = vld [vmem:[#allocation13 + $0x458] sm:$0xff]  ;;  %v1534_v11 = vld [vmem:[#allocation13 + $0x430] sm:$0xff] }
 0x24e   : > { %1784 = vmatpush.msra.mxu1 %v1455_v13  ;;  %v2775_v49 = vsel %vm1391_vm6, %v1309_v12, %v1394_v44  ;;  %v1487_v12 = vld [vmem:[#allocation13 + $0x2b8] sm:$0xff]  ;;  %v1530_v44 = vld [vmem:[#allocation13 + $0x410] sm:$0xff] }
 0x24f   : > { %v1368_v17 = vpop.f32.mrf.mxu2  ;;  %1618 = vmatmul.f32.vlgmr.msra.gmra.mxu0 %v2775_v49  ;;  %1678 = vmatmul.f32.vlgmr.msra.gmra.mxu3 %v2775_v49  ;;  %v1535_v13 = vld [vmem:[#allocation13 + $0x438] sm:$0xff] }
 0x250   : > { %v1369_v55 = vadd.f32 %v1368_v17, %v1267_v14  ;;  %1762 = vmatpush.msra.mxu0 %v1590_v15  ;;  %1785 = vmatpush.msra.mxu1 %v1451_v16  ;;  %v1483_v14 = vld [vmem:[#allocation13 + $0x298] sm:$0xff] }
 0x251   : > { %1822 = vmatpush.msra.mxu3 %v1591_v50  ;;  %v1531_v15 = vld [vmem:[#allocation13 + $0x418] sm:$0xff] }
 0x252   : > { %v1389_v10 = vadd.f32 %v1388_v21, %v1369_v55  ;;  %1763 = vmatpush.msra.mxu0 %v1586_v18  ;;  %1786 = vmatpush.msra.mxu1 %v1447_v19  ;;  %v1479_v16 = vld [vmem:[#allocation13 + $0x278] sm:$0xff] }
 0x253   : > { %1823 = vmatpush.msra.mxu3 %v1587_v20  ;;  %v1471_v50 = vld [vmem:[#allocation13 + $0x238] sm:$0xff] }
 0x254   : > { %v1396_v27 = vmul.f32 0.2, %v1389_v10  ;;  %1764 = vmatpush.msra.mxu0 %v1582_v22  ;;  %1787 = vmatpush.msra.mxu1 %v1443_v23  ;;  %vm1393_vm7 = vcmp.ge.f32.partialorder %v1389_v10, 0.0  ;;  %v1467_v17 = vld [vmem:[#allocation13 + $0x218] sm:$0xff] }
 0x255   : > { %1824 = vmatpush.msra.mxu3 %v1583_v24 }
 0x256   : > { %1765 = vmatpush.msra.mxu0 %v1578_v25  ;;  %1788 = vmatpush.msra.mxu1 %v1439_v26  ;;  %v2779_v29 = vsel %vm1393_vm7, %v1389_v10, %v1396_v27 }
 0x257   : > { %1825 = vmatpush.msra.mxu3 %v1579_v28  ;;  %1658 = vmatmul.f32.vlgmr.msra.gmra.mxu2 %v2779_v29 }
 0x258   : > { %1698 = vmatmul.f32.vlgmr.msrb.gmra.mxu0 %v2772_v9  ;;  %1718 = vmatmul.f32.vlgmr.msrb.gmra.mxu1 %v2779_v29 }
 0x259   : > { %1758 = vmatmul.f32.vlgmr.msrb.gmra.mxu3 %v2772_v9  ;;  %1766 = vmatpush.msra.mxu0 %v1574_v30 }
 0x25a   : > { %1789 = vmatpush.msra.mxu1 %v1435_v31  ;;  %1802 = vmatpush.msra.mxu2 %v1527_v32 }
 0x25b   : > { %1826 = vmatpush.msra.mxu3 %v1575_v33  ;;  %1767 = vmatpush.msra.mxu0 %v1570_v34 }
 0x25c   : > { %1790 = vmatpush.msra.mxu1 %v1431_v35  ;;  %1803 = vmatpush.msra.mxu2 %v1523_v36 }
 0x25d   : > { %1827 = vmatpush.msra.mxu3 %v1571_v37  ;;  %1768 = vmatpush.msra.mxu0 %v1566_v38 }
 0x25e   : > { %1791 = vmatpush.msra.mxu1 %v1427_v39  ;;  %1804 = vmatpush.msra.mxu2 %v1519_v40 }
 0x25f   : > { %1828 = vmatpush.msra.mxu3 %v1567_v41  ;;  %1769 = vmatpush.msra.mxu0 %v1562_v42 }
 0x260   : > { %1792 = vmatpush.msra.mxu1 %v1423_v43  ;;  %1805 = vmatpush.msra.mxu2 %v1515_v45 }
 0x261   : > { %1829 = vmatpush.msra.mxu3 %v1563_v46  ;;  %1738 = vmatmul.f32.vlgmr.msrb.gmra.mxu2 %v2775_v49 }
 0x262   : > { %1770 = vmatpush.msra.mxu0 %v1558_v47  ;;  %1793 = vmatpush.msra.mxu1 %v1419_v48 }
 0x263   : > { %1806 = vmatpush.msra.mxu2 %v1511_v51  ;;  %1830 = vmatpush.msra.mxu3 %v1559_v52 }
 0x264   : > { %1771 = vmatpush.msra.mxu0 %v1554_v53  ;;  %1794 = vmatpush.msra.mxu1 %v1415_v54 }
 0x265   : > { %1807 = vmatpush.msra.mxu2 %v1507_v56  ;;  %1831 = vmatpush.msra.mxu3 %v1555_v57 }
 0x266   : > { %1772 = vmatpush.msra.mxu0 %v1550_v58  ;;  %1795 = vmatpush.msra.mxu1 %v1411_v59 }
 0x267   : > { %1808 = vmatpush.msra.mxu2 %v1503_v60  ;;  %1832 = vmatpush.msra.mxu3 %v1551_v61 }
 0x268   : > { %1773 = vmatpush.msra.mxu0 %v1546_v62  ;;  %1796 = vmatpush.msra.mxu1 %v1407_v63 }
 0x269   : > { %1809 = vmatpush.msra.mxu2 %v1499_v0  ;;  %1833 = vmatpush.msra.mxu3 %v1547_v1 }
 0x26a   : > { %1774 = vmatpush.msra.mxu0 %v1542_v2  ;;  %1797 = vmatpush.msra.mxu1 %v1403_v3 }
 0x26b   : > { %1810 = vmatpush.msra.mxu2 %v1495_v4  ;;  %1834 = vmatpush.msra.mxu3 %v1543_v5 }
 0x26c   : > { %1798 = vmatmul.f32.vlgmr.msra.gmra.mxu1 %v2775_v49  ;;  %1775 = vmatpush.msra.mxu0 %v1538_v6  ;;  %v1475_v49 = vld [vmem:[#allocation13 + $0x258] sm:$0xff] }
 0x26d   : > { %1811 = vmatpush.msra.mxu2 %v1491_v7  ;;  %1835 = vmatpush.msra.mxu3 %v1539_v8 }
 0x26e   : > { %1776 = vmatpush.msra.mxu0 %v1534_v11 }
 0x26f   : > { %1812 = vmatpush.msra.mxu2 %v1487_v12  ;;  %1836 = vmatpush.msra.mxu3 %v1535_v13 }
 0x270   : > { %1777 = vmatpush.msra.mxu0 %v1530_v44 }
 0x271   : > { %1813 = vmatpush.msra.mxu2 %v1483_v14  ;;  %1837 = vmatpush.msra.mxu3 %v1531_v15 }
 0x272   : > { %1778 = vmatmul.f32.vlgmr.msra.gmra.mxu0 %v2779_v29  ;;  %1838 = vmatmul.f32.vlgmr.msra.gmra.mxu3 %v2779_v29 }
 0x273   : > { %1814 = vmatpush.msra.mxu2 %v1479_v16 }
 0x275   : > { %1815 = vmatpush.msra.mxu2 %v1475_v49 }
 0x277   : > { %1816 = vmatpush.msra.mxu2 %v1471_v50 }
 0x279   : > { %1817 = vmatpush.msra.mxu2 %v1467_v17 }
 0x27a   : > { %1818 = vmatmul.f32.vlgmr.msra.gmra.mxu2 %v2772_v9 }
 0x27b   : > { %2431 = shalt.err (!%p2428_p9)
}
 0x27c   : > { %2102 = dma.vmem_to_hbm [thread:$0]  (%p2680_p4), %s1866_s1, 256, %s1868_s30, %s1847_s11  }
 0x27d   : > { %s2872_s25 = sld [smem:[#allocation26_spill]]  ;;  %s2873_s8 = sshll.u32 %s2711_s26, 5 }
 0x27e   : > { %s483_s28 = scalar_lea.vmem [#allocation15], %s2873_s8  ;;  %s2075_s3 = sshll.u32 %s2607_s20, 5 }
 0x27f   : > { %s2874_s11 = sld [smem:[#allocation27_spill]]  ;;  %s1880_s10 = sshll.u32 %s483_s28, 4  ;;  %s1881_s10 = int_to_ptr.vmem [resolvable:$true] %s1880_s10 }
 0x280   : > { %s1852_s21 = scalar_lea.sflag [#allocation16], %s2711_s26 }
 0x283   : > { %v1592_v18 = vld [vmem:[%s2872_s25] sm:$0xf] }
 0x284   : > { %v1595_v55 = vperm.slane %v1592_v18, 1  ;;  %v1594_v20 = vperm.slane %v1592_v18, 0  ;;  %v1596_v30 = vperm.slane %v1592_v18, 2  ;;  %v1597_v37 = vperm.slane %v1592_v18, 3 }
 0x285   : > { %s1878_s23 = scalar_lea.hbm %s2874_s11, %s2075_s3  ;;  %s2452_s22 = scalar_lea.hbm %s2874_s11, 64 }
 0x286   : > { %s1882_s2 = sshll.u32 %s1878_s23, 4  ;;  %s1883_s2 = int_to_ptr.hbm [resolvable:$true] %s1882_s2 }
 0x287   : > { %s2446_s17 = sshra.s32 %s1883_s2, 4  ;;  %s2447_s17 = int_to_ptr.hbm [resolvable:$true] %s2446_s17 }
 0x288   : > { %s2448_s20 = scalar_lea.hbm %s2447_s17, 32  ;;  %p2453_p0 = scmp.lt.s32.totalorder %s2447_s17, %s2874_s11 }
 0x289   : > { %p2449_p10 = scmp.ne.s32.totalorder %s2447_s17, %s2448_s20  ;;  %p2454_p2 = scmp.lt.s32.totalorder %s2452_s22, %s2448_s20 }
 0x28b   : > { %p2450_p13 = pnand %p2449_p10, %p2680_p4  ;;  %p2455_p1 = por %p2454_p2, %p2453_p0 }
 0x28d   : > { %p2451_p11 = pneg %p2450_p13 }
 0x28f   : > { %p2456_p3 = pnand %p2455_p1, %p2451_p11 }
 0x2c6   : > { %v1639_v19 = vpop.f32.mrf.mxu1 }
 0x2cc   : > { %v1619_v9 = vpop.f32.mrf.mxu0 }
 0x2cd   : > { %v1620_v23 = vadd.f32 %v1619_v9, %v1594_v20 }
 0x2cf   : > { %v1640_v27 = vadd.f32 %v1639_v19, %v1620_v23 }
 0x2d2   : > { %v1679_v21 = vpop.f32.mrf.mxu3 }
 0x2d3   : > { %v1680_v22 = vadd.f32 %v1679_v21, %v1595_v55 }
 0x2d5   : > { %v1699_v10 = vpop.f32.mrf.mxu0  ;;  %v1719_v25 = vpop.f32.mrf.mxu1 }
 0x2d6   : > { %v1700_v24 = vadd.f32 %v1699_v10, %v1680_v22 }
 0x2d8   : > { %v1720_v26 = vadd.f32 %v1719_v25, %v1700_v24 }
 0x2da   : > { %1843 = vst [vmem:[%s483_s28 + $0x8] sm:$0xff] %v1720_v26  ;;  %v1659_v28 = vpop.f32.mrf.mxu2 }
 0x2db   : > { %v1660_v29 = vadd.f32 %v1659_v28, %v1640_v27 }
 0x2dc   : > { %v1759_v33 = vpop.f32.mrf.mxu3 }
 0x2dd   : > { %1842 = vst [vmem:[%s483_s28] sm:$0xff] %v1660_v29 }
 0x2e4   : > { %v1739_v31 = vpop.f32.mrf.mxu2 }
 0x2e5   : > { %v1740_v32 = vadd.f32 %v1739_v31, %v1596_v30 }
 0x2e7   : > { %v1760_v34 = vadd.f32 %v1759_v33, %v1740_v32 }
 0x2e9   : > { %v1799_v38 = vpop.f32.mrf.mxu1 }
 0x2ea   : > { %v1800_v39 = vadd.f32 %v1799_v38, %v1597_v37 }
 0x2ef   : > { %v1779_v35 = vpop.f32.mrf.mxu0 }
 0x2f0   : > { %v1780_v36 = vadd.f32 %v1779_v35, %v1760_v34 }
 0x2f2   : > { %1844 = vst [vmem:[%s483_s28 + $0x10] sm:$0xff] %v1780_v36 }
 0x2f5   : > { %v1839_v42 = vpop.f32.mrf.mxu3 }
 0x2fd   : > { %v1819_v40 = vpop.f32.mrf.mxu2 }
 0x2fe   : > { %v1820_v41 = vadd.f32 %v1819_v40, %v1800_v39 }
 0x300   : > { %v1840_v43 = vadd.f32 %v1839_v42, %v1820_v41 }
 0x302   : > { %1845 = vst [vmem:[%s483_s28 + $0x18] sm:$0xff] %v1840_v43 }
 0x303   : > { %2459 = shalt.err (!%p2456_p3)
}
 0x304   : > { %2103 = dma.vmem_to_hbm [thread:$0]  (%p2680_p4), %s1881_s10, 512, %s1883_s2, %s1852_s21  }
 0x305 PF: > { %s1894_s26 = sand.u32 1, %s2502_s13   ;;  %p2875_p5 = scmp.ge.s32.totalorder %s2514_s16, 2 }
 0x306   : > { %s1895_s28 = scalar_lea.sflag [#allocation4], %s1894_s26 }
 0x307   : > { %p2130_p12 = pnand %p2875_p5, %p2684_p6 }
 0x309   : > { %p2131_p7 = pneg %p2130_p12 }
 0x30b   : > { %2493 = dma.done.wait (%p2131_p7), %s1895_s28, 256  }
 0x30c   : > { %2495 = vsyncadd (%p2131_p7), %s1895_s28, 4294967040  ;;  %s1905_s3 = scalar_lea.sflag [#allocation16], %s1894_s26 }
 0x30d   : > { %2497 = dma.done.wait (%p2131_p7), %s1905_s3, 512  }
 0x30e   : > { %2499 = vsyncadd (%p2131_p7), %s1905_s3, 4294966784  ;;  %p30_p4 = scmp.ge.s32.totalorder %s2654_s24, 4   ;;  %s2876_s13 = smov %s2506_s14 }
 0x30f   : > { %s2877_s14 = smov %s2510_s15  ;;  %s2878_s15 = smov %s2665_s19 }
 0x310   : > { %s2879_s16 = smov %s2654_s24  ;;  %32 = sbr.rel (!%p30_p4) target bundleno = 16 (0x10), region = 142 }
 0x315   :  { %1911 = vsyncpa [#allocation3], 1 }
 0x316   :  { %1913 = vsyncpa [#allocation3 + $0x1], 1 }
 0x317   :  { %1914 = vsyncpa [#allocation6], 1 }
 0x318   :  { %1915 = vsyncpa [#allocation9], 1 }
 0x319   :  { %1916 = vsyncpa [#allocation12], 1 }
 0x31a   :  { %1917 = vsyncpa [#allocation4], 1 }
 0x31b   :  { %1919 = vsyncpa [#allocation4 + $0x1], 1 }
 0x31c   :  { %1920 = vsyncpa [#allocation16], 1 }
 0x31d   :  { %1922 = vsyncpa [#allocation16 + $0x1], 1 }

</bundles_post_ra>
